<compile_context>
chip_gen: v7x
topology: tpu7x:2x2x1
jax: 0.10.0
libtpu: 0.0.40
codegen_flags: <defaults>
</compile_context>

<pallas_src>
from functools import partial

import jax
import jax.numpy as jnp
from jax import lax
from jax.experimental import pallas as pl
from jax.experimental.pallas import tpu as pltpu


# ----------------------------- in-kernel helpers -----------------------------

def _erf(z):
    # Abramowitz & Stegun 7.1.26 (|err| < 1.5e-7).  The divide is routed to the
    # EUP via pl.reciprocal(approx=True) so it does not occupy a VALU slot.
    a1, a2, a3, a4, a5 = (0.254829592, -0.284496736, 1.421413741,
                          -1.453152027, 1.061405429)
    p = 0.3275911
    sgn = jnp.where(z >= 0.0, 1.0, -1.0)
    az = jnp.abs(z)
    t = pl.reciprocal(1.0 + p * az, approx=True)
    poly = ((((a5 * t + a4) * t + a3) * t + a2) * t + a1) * t
    return sgn * (1.0 - poly * jnp.exp(-az * az))


def _gelu(x):
    return 0.5 * x * (1.0 + _erf(x * 0.7071067811865476))


def _layernorm(x, w, b, eps=1e-5):
    mu = jnp.mean(x, axis=-1, keepdims=True)
    var = jnp.mean(jnp.square(x - mu), axis=-1, keepdims=True)
    return (x - mu) * lax.rsqrt(var + eps) * w + b


# --------------------------------- kernel ------------------------------------

def _block_kernel(x_ref,                       # VMEM (Bt, N, D)
                  dp1_ref, dp2_ref,            # VMEM (Bt, 1, 1) DropPath scales
                  n1w_ref, n1b_ref,            # (1, D) f32
                  qw_ref, qb_ref,              # (H, D, Dh) bf16, (H, 1, Dh) f32
                  kw_ref, kb_ref,
                  vw_ref, vb_ref,
                  pw_ref, projb_ref,           # (H, Dh, D) bf16, (1, D) f32
                  n2w_ref, n2b_ref,            # (1, D) f32
                  fc1w_ref, fc1b_ref,          # (D, Hm) bf16, (1, Hm) f32
                  fc2w_ref, fc2b_ref,          # (Hm, D) bf16, (1, D) f32
                  o_ref,                       # VMEM (Bt, N, D)
                  *, attn_scale):
    f32 = jnp.float32
    bf16 = jnp.bfloat16

    Bt, N, D = x_ref.shape
    H, _, Dh = qw_ref.shape
    M = Bt * N

    x3 = x_ref[...].astype(f32)                       # residual carried in f32
    x2 = x3.reshape(M, D)

    # ----- attention branch ---------------------------------------------------
    xn = _layernorm(x2, n1w_ref[...], n1b_ref[...])   # f32 stats
    xn_bf = xn.astype(bf16)                           # bf16 MXU operand

    def head_body(h, acc):
        # Per-head Q/K/V straight out of their own MXU matmuls (no lane slicing).
        q = (jnp.dot(xn_bf, qw_ref[h], preferred_element_type=f32)
             + qb_ref[h]) * attn_scale                # scale folded into q (M, Dh)
        k = jnp.dot(xn_bf, kw_ref[h], preferred_element_type=f32) + kb_ref[h]
        v = jnp.dot(xn_bf, vw_ref[h], preferred_element_type=f32) + vb_ref[h]
        q3 = q.astype(bf16).reshape(Bt, N, Dh)
        k3 = k.astype(bf16).reshape(Bt, N, Dh)
        v3 = v.astype(bf16).reshape(Bt, N, Dh)

        s = jnp.einsum("bqh,bkh->bqk", q3, k3,
                       preferred_element_type=f32)    # (Bt, N, N) f32
        s = s - jnp.max(s, axis=-1, keepdims=True)
        p = jnp.exp(s)
        p = p * pl.reciprocal(jnp.sum(p, axis=-1, keepdims=True), approx=True)

        ho = jnp.einsum("bqk,bkh->bqh", p.astype(bf16), v3,
                        preferred_element_type=f32)   # (Bt, N, Dh)
        ho2 = ho.reshape(M, Dh).astype(bf16)
        # Accumulate head @ sublane-aligned proj slab -> no lane-dim concat.
        return acc + jnp.dot(ho2, pw_ref[h], preferred_element_type=f32)

    attn = lax.fori_loop(0, H, head_body, jnp.zeros((M, D), f32))
    attn = attn + projb_ref[...]

    # DropPath fused into the residual add (per-sample scale).
    x3 = x3 + dp1_ref[...] * attn.reshape(Bt, N, D)

    # ----- MLP branch ---------------------------------------------------------
    x2 = x3.reshape(M, D)
    xn2 = _layernorm(x2, n2w_ref[...], n2b_ref[...])
    hdn = (jnp.dot(xn2.astype(bf16), fc1w_ref[...],
                   preferred_element_type=f32) + fc1b_ref[...])
    hdn = _gelu(hdn)                                  # f32
    mlp = (jnp.dot(hdn.astype(bf16), fc2w_ref[...],
                   preferred_element_type=f32) + fc2b_ref[...])

    x3 = x3 + dp2_ref[...] * mlp.reshape(Bt, N, D)
    o_ref[...] = x3.astype(o_ref.dtype)


# --------------------------------- wrapper -----------------------------------

def _choose_block_b(B, N):
    """Samples per grid step: fill the MXU M dim (>=256 rows) while keeping
    >= 2 grid steps when the batch allows (v7x has 2 TensorCores)."""
    divisors = [d for d in range(1, B + 1) if B % d == 0]
    cands = [d for d in divisors if d <= max(1, B // 2)] or divisors
    for d in cands:
        if d * N >= 256:
            return d
    return cands[-1]


def vit_block_pallas(x, params, keep, *, num_heads, drop_path_prob=0.0,
                     training=False, qk_scale=None, block_b=None):
    """x: (B, N, D). keep: (2, B) int DropPath keep masks (used iff training and
    drop_path_prob > 0)."""
    B, N, D = x.shape
    H = num_heads
    Dh = D // H
    Hm = params["fc1_w"].shape[1]
    f32, bf16 = jnp.float32, jnp.bfloat16

    # DropPath scale per sample, computed on host (no in-kernel PRNG).
    if drop_path_prob > 0.0 and training:
        kp = 1.0 - drop_path_prob
        dp = keep.astype(f32) / kp                    # (2, B)
    else:
        dp = jnp.ones((2, B), f32)
    dp1 = dp[0].reshape(B, 1, 1)
    dp2 = dp[1].reshape(B, 1, 1)

    if block_b is None:
        block_b = _choose_block_b(B, N)
    assert B % block_b == 0
    grid_b = B // block_b

    # Weight preprocessing: bf16 MXU operands, per-head slabs, f32 biases.
    qkv_w = params["qkv_w"]                           # (D, 3D) -> [q | k | v]
    qkv_b = params["qkv_b"]                           # (3D,)

    def per_head_w(w):                                # (D, D) -> (H, D, Dh)
        return jnp.transpose(w.reshape(D, H, Dh), (1, 0, 2)).astype(bf16)

    def per_head_b(b):                                # (D,) -> (H, 1, Dh)
        return b.reshape(H, 1, Dh).astype(f32)

    qw = per_head_w(qkv_w[:, 0 * D:1 * D])
    kw = per_head_w(qkv_w[:, 1 * D:2 * D])
    vw = per_head_w(qkv_w[:, 2 * D:3 * D])
    qb = per_head_b(qkv_b[0 * D:1 * D])
    kb = per_head_b(qkv_b[1 * D:2 * D])
    vb = per_head_b(qkv_b[2 * D:3 * D])
    pw = params["proj_w"].reshape(H, Dh, D).astype(bf16)   # per-head proj slabs
    projb = params["proj_b"].reshape(1, D).astype(f32)

    n1w = params["norm1_w"].reshape(1, D).astype(f32)
    n1b = params["norm1_b"].reshape(1, D).astype(f32)
    n2w = params["norm2_w"].reshape(1, D).astype(f32)
    n2b = params["norm2_b"].reshape(1, D).astype(f32)
    fc1w = params["fc1_w"].astype(bf16)
    fc1b = params["fc1_b"].reshape(1, Hm).astype(f32)
    fc2w = params["fc2_w"].astype(bf16)
    fc2b = params["fc2_b"].reshape(1, D).astype(f32)

    attn_scale = float(qk_scale) if qk_scale is not None else float(Dh ** -0.5)
    kernel = partial(_block_kernel, attn_scale=attn_scale)

    per_b3 = lambda b: (b, 0, 0)                      # activations / DropPath
    full2 = lambda b: (0, 0)                          # resident weights (2-D)
    full3 = lambda b: (0, 0, 0)                       # resident weights (3-D)

    grid_spec = pltpu.PrefetchScalarGridSpec(
        num_scalar_prefetch=0,
        grid=(grid_b,),
        in_specs=[
            pl.BlockSpec((block_b, N, D), per_b3),                          # x
            pl.BlockSpec((block_b, 1, 1), per_b3),                          # dp1
            pl.BlockSpec((block_b, 1, 1), per_b3),                          # dp2
            pl.BlockSpec((1, D), full2), pl.BlockSpec((1, D), full2),       # norm1
            pl.BlockSpec((H, D, Dh), full3), pl.BlockSpec((H, 1, Dh), full3),  # q
            pl.BlockSpec((H, D, Dh), full3), pl.BlockSpec((H, 1, Dh), full3),  # k
            pl.BlockSpec((H, D, Dh), full3), pl.BlockSpec((H, 1, Dh), full3),  # v
            pl.BlockSpec((H, Dh, D), full3), pl.BlockSpec((1, D), full2),   # proj
            pl.BlockSpec((1, D), full2), pl.BlockSpec((1, D), full2),       # norm2
            pl.BlockSpec((D, Hm), full2), pl.BlockSpec((1, Hm), full2),     # fc1
            pl.BlockSpec((Hm, D), full2), pl.BlockSpec((1, D), full2),      # fc2
        ],
        out_specs=pl.BlockSpec((block_b, N, D), per_b3),
    )

    return pl.pallas_call(
        kernel,
        out_shape=jax.ShapeDtypeStruct((B, N, D), x.dtype),
        grid_spec=grid_spec,
        compiler_params=pltpu.CompilerParams(
            dimension_semantics=("parallel",),
            vmem_limit_bytes=64 * 1024 * 1024,
        ),
    )(x, dp1, dp2,
      n1w, n1b, qw, qb, kw, kb, vw, vb, pw, projb,
      n2w, n2b, fc1w, fc1b, fc2w, fc2b)


# --------------------------- pure-JAX reference -------------------------------

def vit_block_ref(x, params, keep, *, num_heads, drop_path_prob, training):
    B, N, D = x.shape
    Dh = D // num_heads
    hp = jax.lax.Precision.HIGHEST
    if drop_path_prob > 0.0 and training:
        kp = 1.0 - drop_path_prob
        s1 = keep[0].astype(jnp.float32) / kp
        s2 = keep[1].astype(jnp.float32) / kp
    else:
        s1 = jnp.ones((B,), jnp.float32)
        s2 = jnp.ones((B,), jnp.float32)

    def ln(v, w, b):
        mu = jnp.mean(v, axis=-1, keepdims=True)
        var = jnp.mean(jnp.square(v - mu), axis=-1, keepdims=True)
        return (v - mu) / jnp.sqrt(var + 1e-5) * w + b

    xn = ln(x, params["norm1_w"], params["norm1_b"])
    qkv = jnp.einsum("bnd,de->bne", xn, params["qkv_w"], precision=hp) + params["qkv_b"]
    qkv = jnp.transpose(qkv.reshape(B, N, 3, num_heads, Dh), (2, 0, 3, 1, 4))
    q, k, v = qkv[0], qkv[1], qkv[2]
    attn = jnp.einsum("bhqd,bhkd->bhqk", q, k, precision=hp) * (Dh ** -0.5)
    attn = jax.nn.softmax(attn, axis=-1)
    out = jnp.einsum("bhqk,bhkd->bhqd", attn, v, precision=hp)
    out = jnp.transpose(out, (0, 2, 1, 3)).reshape(B, N, D)
    out = jnp.einsum("bnd,de->bne", out, params["proj_w"], precision=hp) + params["proj_b"]
    x = x + s1[:, None, None] * out

    xn2 = ln(x, params["norm2_w"], params["norm2_b"])
    h = jnp.einsum("bnd,dh->bnh", xn2, params["fc1_w"], precision=hp) + params["fc1_b"]
    h = jax.nn.gelu(h, approximate=False)
    h = jnp.einsum("bnh,hd->bnd", h, params["fc2_w"], precision=hp) + params["fc2_b"]
    x = x + s2[:, None, None] * h
    return x


# ----------------------------------- main -------------------------------------

if __name__ == "__main__":
    import numpy as np

    B, N, D = 2, 8, 32
    num_heads = 4
    Hm = int(D * 4.0)            # mlp_ratio = 4.0
    drop_path_prob = 0.25

    key = jax.random.PRNGKey(0)
    keys = jax.random.split(key, 12)
    x = jax.random.normal(keys[0], (B, N, D), dtype=jnp.float32)

    def init(k, shape, scale=0.1):
        return scale * jax.random.normal(k, shape, dtype=jnp.float32)

    params = {
        "norm1_w": 1.0 + init(keys[1], (D,)),
        "norm1_b": init(keys[2], (D,)),
        "qkv_w":   init(keys[3], (D, 3 * D)),
        "qkv_b":   jnp.zeros((3 * D,), jnp.float32),   # qkv_bias=False (module default)
        "proj_w":  init(keys[4], (D, D)),
        "proj_b":  init(keys[5], (D,)),
        "norm2_w": 1.0 + init(keys[6], (D,)),
        "norm2_b": init(keys[7], (D,)),
        "fc1_w":   init(keys[8], (D, Hm)),
        "fc1_b":   init(keys[9], (Hm,)),
        "fc2_w":   init(keys[10], (Hm, D)),
        "fc2_b":   init(keys[11], (D,)),
    }

    # DropPath masks: exactly PyTorch's floor(keep_prob + U[0,1)), one per sample
    # per drop_path call (2 calls in Block.forward).
    keep_prob = 1.0 - drop_path_prob
    u = jax.random.uniform(jax.random.PRNGKey(123), (2, B), dtype=jnp.float32)
    keep = jnp.floor(keep_prob + u).astype(jnp.int32)

    # Tolerances accommodate bf16 MXU operands (f32 accumulation) vs f32 reference.
    out = vit_block_pallas(x, params, keep, num_heads=num_heads,
                           drop_path_prob=drop_path_prob, training=True)
    out = jax.block_until_ready(out)
    ref = vit_block_ref(x, params, keep, num_heads=num_heads,
                        drop_path_prob=drop_path_prob, training=True)
    np.testing.assert_allclose(np.asarray(out), np.asarray(ref),
                               rtol=2e-2, atol=2e-2)

    # Eval mode: DropPath is identity.
    out_eval = vit_block_pallas(x, params, keep, num_heads=num_heads,
                                drop_path_prob=drop_path_prob, training=False)
    out_eval = jax.block_until_ready(out_eval)
    ref_eval = vit_block_ref(x, params, keep, num_heads=num_heads,
                             drop_path_prob=drop_path_prob, training=False)
    np.testing.assert_allclose(np.asarray(out_eval), np.asarray(ref_eval),
                               rtol=2e-2, atol=2e-2)

    print("KERNEL_OK")
</pallas_src>

<mosaic_0001>
module attributes {stable_mosaic.version = 11 : i64} {
  func.func @_block_kernel(%arg0: i32, %arg1: memref<1x8x32xf32, #tpu.memory_space<vmem>>, %arg2: memref<1x1x1xf32, #tpu.memory_space<vmem>>, %arg3: memref<1x1x1xf32, #tpu.memory_space<vmem>>, %arg4: memref<1x32xf32, #tpu.memory_space<vmem>>, %arg5: memref<1x32xf32, #tpu.memory_space<vmem>>, %arg6: memref<4x32x8xbf16, #tpu.memory_space<vmem>>, %arg7: memref<4x1x8xf32, #tpu.memory_space<vmem>>, %arg8: memref<4x32x8xbf16, #tpu.memory_space<vmem>>, %arg9: memref<4x1x8xf32, #tpu.memory_space<vmem>>, %arg10: memref<4x32x8xbf16, #tpu.memory_space<vmem>>, %arg11: memref<4x1x8xf32, #tpu.memory_space<vmem>>, %arg12: memref<4x8x32xbf16, #tpu.memory_space<vmem>>, %arg13: memref<1x32xf32, #tpu.memory_space<vmem>>, %arg14: memref<1x32xf32, #tpu.memory_space<vmem>>, %arg15: memref<1x32xf32, #tpu.memory_space<vmem>>, %arg16: memref<32x128xbf16, #tpu.memory_space<vmem>>, %arg17: memref<1x128xf32, #tpu.memory_space<vmem>>, %arg18: memref<128x32xbf16, #tpu.memory_space<vmem>>, %arg19: memref<1x32xf32, #tpu.memory_space<vmem>>, %arg20: memref<1x8x32xf32, #tpu.memory_space<vmem>>) attributes {dimension_semantics = [#tpu.dimension_semantics<parallel>], iteration_bounds = array<i64: 2>, scalar_prefetch = 0 : i64, scratch_operands = 0 : i64, tpu.core_type = #tpu.core_type<tc>, window_params = [{transform_indices = @transform_0, window_bounds = array<i64: 1, 8, 32>}, {transform_indices = @transform_1, window_bounds = array<i64: 1, 1, 1>}, {transform_indices = @transform_2, window_bounds = array<i64: 1, 1, 1>}, {pipeline_mode = #tpu.pipeline_mode<synchronous>, transform_indices = @transform_3, window_bounds = array<i64: 1, 32>}, {pipeline_mode = #tpu.pipeline_mode<synchronous>, transform_indices = @transform_4, window_bounds = array<i64: 1, 32>}, {pipeline_mode = #tpu.pipeline_mode<synchronous>, transform_indices = @transform_5, window_bounds = array<i64: 4, 32, 8>}, {pipeline_mode = #tpu.pipeline_mode<synchronous>, transform_indices = @transform_6, window_bounds = array<i64: 4, 1, 8>}, {pipeline_mode = #tpu.pipeline_mode<synchronous>, transform_indices = @transform_7, window_bounds = array<i64: 4, 32, 8>}, {pipeline_mode = #tpu.pipeline_mode<synchronous>, transform_indices = @transform_8, window_bounds = array<i64: 4, 1, 8>}, {pipeline_mode = #tpu.pipeline_mode<synchronous>, transform_indices = @transform_9, window_bounds = array<i64: 4, 32, 8>}, {pipeline_mode = #tpu.pipeline_mode<synchronous>, transform_indices = @transform_10, window_bounds = array<i64: 4, 1, 8>}, {pipeline_mode = #tpu.pipeline_mode<synchronous>, transform_indices = @transform_11, window_bounds = array<i64: 4, 8, 32>}, {pipeline_mode = #tpu.pipeline_mode<synchronous>, transform_indices = @transform_12, window_bounds = array<i64: 1, 32>}, {pipeline_mode = #tpu.pipeline_mode<synchronous>, transform_indices = @transform_13, window_bounds = array<i64: 1, 32>}, {pipeline_mode = #tpu.pipeline_mode<synchronous>, transform_indices = @transform_14, window_bounds = array<i64: 1, 32>}, {pipeline_mode = #tpu.pipeline_mode<synchronous>, transform_indices = @transform_15, window_bounds = array<i64: 32, 128>}, {pipeline_mode = #tpu.pipeline_mode<synchronous>, transform_indices = @transform_16, window_bounds = array<i64: 1, 128>}, {pipeline_mode = #tpu.pipeline_mode<synchronous>, transform_indices = @transform_17, window_bounds = array<i64: 128, 32>}, {pipeline_mode = #tpu.pipeline_mode<synchronous>, transform_indices = @transform_18, window_bounds = array<i64: 1, 32>}, {transform_indices = @transform_19, window_bounds = array<i64: 1, 8, 32>}]} {
    %c0 = arith.constant 0 : index
    %c0_0 = arith.constant 0 : index
    %c0_1 = arith.constant 0 : index
    %0 = vector.load %arg1[%c0, %c0_0, %c0_1] : memref<1x8x32xf32, #tpu.memory_space<vmem>>, vector<1x8x32xf32>
    %1 = vector.shape_cast %0 : vector<1x8x32xf32> to vector<8x32xf32>
    %c0_2 = arith.constant 0 : index
    %c0_3 = arith.constant 0 : index
    %2 = vector.load %arg4[%c0_2, %c0_3] : memref<1x32xf32, #tpu.memory_space<vmem>>, vector<1x32xf32>
    %c0_4 = arith.constant 0 : index
    %c0_5 = arith.constant 0 : index
    %3 = vector.load %arg5[%c0_4, %c0_5] : memref<1x32xf32, #tpu.memory_space<vmem>>, vector<1x32xf32>
    %cst = arith.constant dense<0.000000e+00> : vector<8xf32>
    %4 = vector.multi_reduction <add>, %1, %cst [1] : vector<8x32xf32> to vector<8xf32>
    %5 = vector.shape_cast %4 : vector<8xf32> to vector<8x1xf32>
    %cst_6 = arith.constant 3.200000e+01 : f32
    %6 = vector.broadcast %cst_6 : f32 to vector<8x1xf32>
    %7 = arith.divf %5, %6 : vector<8x1xf32>
    %8 = vector.broadcast %7 : vector<8x1xf32> to vector<8x32xf32>
    %9 = arith.subf %1, %8 : vector<8x32xf32>
    %10 = arith.mulf %9, %9 : vector<8x32xf32>
    %cst_7 = arith.constant dense<0.000000e+00> : vector<8xf32>
    %11 = vector.multi_reduction <add>, %10, %cst_7 [1] : vector<8x32xf32> to vector<8xf32>
    %12 = vector.shape_cast %11 : vector<8xf32> to vector<8x1xf32>
    %cst_8 = arith.constant 3.200000e+01 : f32
    %13 = vector.broadcast %cst_8 : f32 to vector<8x1xf32>
    %14 = arith.divf %12, %13 : vector<8x1xf32>
    %15 = vector.broadcast %7 : vector<8x1xf32> to vector<8x32xf32>
    %16 = arith.subf %1, %15 : vector<8x32xf32>
    %cst_9 = arith.constant 9.99999974E-6 : f32
    %17 = vector.broadcast %cst_9 : f32 to vector<8x1xf32>
    %18 = arith.addf %14, %17 : vector<8x1xf32>
    %19 = math.rsqrt %18 : vector<8x1xf32>
    %20 = vector.broadcast %19 : vector<8x1xf32> to vector<8x32xf32>
    %21 = arith.mulf %16, %20 : vector<8x32xf32>
    %22 = vector.broadcast %2 : vector<1x32xf32> to vector<8x32xf32>
    %23 = arith.mulf %21, %22 : vector<8x32xf32>
    %24 = vector.broadcast %3 : vector<1x32xf32> to vector<8x32xf32>
    %25 = arith.addf %23, %24 : vector<8x32xf32>
    %26 = arith.truncf %25 : vector<8x32xf32> to vector<8x32xbf16>
    %cst_10 = arith.constant 0.000000e+00 : f32
    %27 = vector.broadcast %cst_10 : f32 to vector<8x32xf32>
    %c0_i32 = arith.constant 0 : i32
    %c4_i32 = arith.constant 4 : i32
    %28 = arith.addi %c0_i32, %c4_i32 : i32
    %c1_i32 = arith.constant 1 : i32
    %29 = scf.for %arg21 = %c0_i32 to %28 step %c1_i32 iter_args(%arg22 = %27) -> (vector<8x32xf32>)  : i32 {
      %121 = arith.index_cast %arg21 : i32 to index
      %c0_57 = arith.constant 0 : index
      %c0_58 = arith.constant 0 : index
      %122 = vector.load %arg6[%121, %c0_57, %c0_58] : memref<4x32x8xbf16, #tpu.memory_space<vmem>>, vector<1x32x8xbf16>
      %123 = vector.shape_cast %122 : vector<1x32x8xbf16> to vector<32x8xbf16>
      %cst_59 = arith.constant dense<0.000000e+00> : vector<8x8xf32>
      %124 = tpu.matmul %26, %123, %cst_59 {dimension_numbers = #tpu.dot_dimension_numbers<[1], [0], [0], [1], [0, 0, 1, 1], [], []>} : vector<8x32xbf16>, vector<32x8xbf16>, vector<8x8xf32> -> vector<8x8xf32>
      %125 = arith.index_cast %arg21 : i32 to index
      %c0_60 = arith.constant 0 : index
      %c0_61 = arith.constant 0 : index
      %126 = vector.load %arg7[%125, %c0_60, %c0_61] : memref<4x1x8xf32, #tpu.memory_space<vmem>>, vector<1x1x8xf32>
      %127 = vector.shape_cast %126 : vector<1x1x8xf32> to vector<1x8xf32>
      %128 = vector.broadcast %127 : vector<1x8xf32> to vector<8x8xf32>
      %129 = arith.addf %124, %128 : vector<8x8xf32>
      %cst_62 = arith.constant 0.353553385 : f32
      %130 = vector.broadcast %cst_62 : f32 to vector<8x8xf32>
      %131 = arith.mulf %129, %130 : vector<8x8xf32>
      %132 = arith.index_cast %arg21 : i32 to index
      %c0_63 = arith.constant 0 : index
      %c0_64 = arith.constant 0 : index
      %133 = vector.load %arg8[%132, %c0_63, %c0_64] : memref<4x32x8xbf16, #tpu.memory_space<vmem>>, vector<1x32x8xbf16>
      %134 = vector.shape_cast %133 : vector<1x32x8xbf16> to vector<32x8xbf16>
      %cst_65 = arith.constant dense<0.000000e+00> : vector<8x8xf32>
      %135 = tpu.matmul %26, %134, %cst_65 {dimension_numbers = #tpu.dot_dimension_numbers<[1], [0], [0], [1], [0, 0, 1, 1], [], []>} : vector<8x32xbf16>, vector<32x8xbf16>, vector<8x8xf32> -> vector<8x8xf32>
      %136 = arith.index_cast %arg21 : i32 to index
      %c0_66 = arith.constant 0 : index
      %c0_67 = arith.constant 0 : index
      %137 = vector.load %arg9[%136, %c0_66, %c0_67] : memref<4x1x8xf32, #tpu.memory_space<vmem>>, vector<1x1x8xf32>
      %138 = vector.shape_cast %137 : vector<1x1x8xf32> to vector<1x8xf32>
      %139 = vector.broadcast %138 : vector<1x8xf32> to vector<8x8xf32>
      %140 = arith.addf %135, %139 : vector<8x8xf32>
      %141 = arith.index_cast %arg21 : i32 to index
      %c0_68 = arith.constant 0 : index
      %c0_69 = arith.constant 0 : index
      %142 = vector.load %arg10[%141, %c0_68, %c0_69] : memref<4x32x8xbf16, #tpu.memory_space<vmem>>, vector<1x32x8xbf16>
      %143 = vector.shape_cast %142 : vector<1x32x8xbf16> to vector<32x8xbf16>
      %cst_70 = arith.constant dense<0.000000e+00> : vector<8x8xf32>
      %144 = tpu.matmul %26, %143, %cst_70 {dimension_numbers = #tpu.dot_dimension_numbers<[1], [0], [0], [1], [0, 0, 1, 1], [], []>} : vector<8x32xbf16>, vector<32x8xbf16>, vector<8x8xf32> -> vector<8x8xf32>
      %145 = arith.index_cast %arg21 : i32 to index
      %c0_71 = arith.constant 0 : index
      %c0_72 = arith.constant 0 : index
      %146 = vector.load %arg11[%145, %c0_71, %c0_72] : memref<4x1x8xf32, #tpu.memory_space<vmem>>, vector<1x1x8xf32>
      %147 = vector.shape_cast %146 : vector<1x1x8xf32> to vector<1x8xf32>
      %148 = vector.broadcast %147 : vector<1x8xf32> to vector<8x8xf32>
      %149 = arith.addf %144, %148 : vector<8x8xf32>
      %150 = arith.truncf %131 : vector<8x8xf32> to vector<8x8xbf16>
      %151 = vector.shape_cast %150 : vector<8x8xbf16> to vector<1x8x8xbf16>
      %152 = arith.truncf %140 : vector<8x8xf32> to vector<8x8xbf16>
      %153 = vector.shape_cast %152 : vector<8x8xbf16> to vector<1x8x8xbf16>
      %154 = arith.truncf %149 : vector<8x8xf32> to vector<8x8xbf16>
      %155 = vector.shape_cast %154 : vector<8x8xbf16> to vector<1x8x8xbf16>
      "tpu.trace_start"() <{level = 10 : i32, message = "bqh,bkh->bqk"}> : () -> ()
      %cst_73 = arith.constant dense<0.000000e+00> : vector<1x8x8xf32>
      %156 = tpu.matmul %151, %153, %cst_73 {dimension_numbers = #tpu.dot_dimension_numbers<[2], [2], [1], [1], [0, 0, 0, 1, 1, 1], [0], [0]>} : vector<1x8x8xbf16>, vector<1x8x8xbf16>, vector<1x8x8xf32> -> vector<1x8x8xf32>
      "tpu.trace_stop"() : () -> ()
      %cst_74 = arith.constant dense<0xFF800000> : vector<1x8xf32>
      %157 = vector.multi_reduction <maximumf>, %156, %cst_74 [2] : vector<1x8x8xf32> to vector<1x8xf32>
      %158 = vector.shape_cast %157 : vector<1x8xf32> to vector<1x8x1xf32>
      %159 = vector.broadcast %158 : vector<1x8x1xf32> to vector<1x8x8xf32>
      %160 = arith.subf %156, %159 : vector<1x8x8xf32>
      %161 = math.exp %160 : vector<1x8x8xf32>
      %cst_75 = arith.constant dense<0.000000e+00> : vector<1x8xf32>
      %162 = vector.multi_reduction <add>, %161, %cst_75 [2] : vector<1x8x8xf32> to vector<1x8xf32>
      %163 = vector.shape_cast %162 : vector<1x8xf32> to vector<1x8x1xf32>
      %164 = tpu.reciprocal %163 {approx = true} : vector<1x8x1xf32> -> vector<1x8x1xf32>
      %165 = vector.broadcast %164 : vector<1x8x1xf32> to vector<1x8x8xf32>
      %166 = arith.mulf %161, %165 : vector<1x8x8xf32>
      %167 = arith.truncf %166 : vector<1x8x8xf32> to vector<1x8x8xbf16>
      "tpu.trace_start"() <{level = 10 : i32, message = "bqk,bkh->bqh"}> : () -> ()
      %cst_76 = arith.constant dense<0.000000e+00> : vector<1x8x8xf32>
      %168 = tpu.matmul %167, %155, %cst_76 {dimension_numbers = #tpu.dot_dimension_numbers<[2], [1], [1], [2], [0, 0, 0, 1, 1, 2], [0], [0]>} : vector<1x8x8xbf16>, vector<1x8x8xbf16>, vector<1x8x8xf32> -> vector<1x8x8xf32>
      "tpu.trace_stop"() : () -> ()
      %169 = vector.shape_cast %168 : vector<1x8x8xf32> to vector<8x8xf32>
      %170 = arith.truncf %169 : vector<8x8xf32> to vector<8x8xbf16>
      %171 = arith.index_cast %arg21 : i32 to index
      %c0_77 = arith.constant 0 : index
      %c0_78 = arith.constant 0 : index
      %172 = vector.load %arg12[%171, %c0_77, %c0_78] : memref<4x8x32xbf16, #tpu.memory_space<vmem>>, vector<1x8x32xbf16>
      %173 = vector.shape_cast %172 : vector<1x8x32xbf16> to vector<8x32xbf16>
      %cst_79 = arith.constant dense<0.000000e+00> : vector<8x32xf32>
      %174 = tpu.matmul %170, %173, %cst_79 {dimension_numbers = #tpu.dot_dimension_numbers<[1], [0], [0], [1], [0, 0, 1, 1], [], []>} : vector<8x8xbf16>, vector<8x32xbf16>, vector<8x32xf32> -> vector<8x32xf32>
      %175 = arith.addf %arg22, %174 : vector<8x32xf32>
      scf.yield %175 : vector<8x32xf32>
    }
    %c4_i32_11 = arith.constant 4 : i32
    %c0_12 = arith.constant 0 : index
    %c0_13 = arith.constant 0 : index
    %30 = vector.load %arg13[%c0_12, %c0_13] : memref<1x32xf32, #tpu.memory_space<vmem>>, vector<1x32xf32>
    %31 = vector.broadcast %30 : vector<1x32xf32> to vector<8x32xf32>
    %32 = arith.addf %29, %31 : vector<8x32xf32>
    %c0_14 = arith.constant 0 : index
    %c0_15 = arith.constant 0 : index
    %c0_16 = arith.constant 0 : index
    %33 = vector.load %arg2[%c0_14, %c0_15, %c0_16] : memref<1x1x1xf32, #tpu.memory_space<vmem>>, vector<1x1x1xf32>
    %34 = vector.shape_cast %32 : vector<8x32xf32> to vector<1x8x32xf32>
    %35 = vector.broadcast %33 : vector<1x1x1xf32> to vector<1x8x32xf32>
    %36 = arith.mulf %35, %34 : vector<1x8x32xf32>
    %37 = arith.addf %0, %36 : vector<1x8x32xf32>
    %38 = vector.shape_cast %37 : vector<1x8x32xf32> to vector<8x32xf32>
    %c0_17 = arith.constant 0 : index
    %c0_18 = arith.constant 0 : index
    %39 = vector.load %arg14[%c0_17, %c0_18] : memref<1x32xf32, #tpu.memory_space<vmem>>, vector<1x32xf32>
    %c0_19 = arith.constant 0 : index
    %c0_20 = arith.constant 0 : index
    %40 = vector.load %arg15[%c0_19, %c0_20] : memref<1x32xf32, #tpu.memory_space<vmem>>, vector<1x32xf32>
    %cst_21 = arith.constant dense<0.000000e+00> : vector<8xf32>
    %41 = vector.multi_reduction <add>, %38, %cst_21 [1] : vector<8x32xf32> to vector<8xf32>
    %42 = vector.shape_cast %41 : vector<8xf32> to vector<8x1xf32>
    %cst_22 = arith.constant 3.200000e+01 : f32
    %43 = vector.broadcast %cst_22 : f32 to vector<8x1xf32>
    %44 = arith.divf %42, %43 : vector<8x1xf32>
    %45 = vector.broadcast %44 : vector<8x1xf32> to vector<8x32xf32>
    %46 = arith.subf %38, %45 : vector<8x32xf32>
    %47 = arith.mulf %46, %46 : vector<8x32xf32>
    %cst_23 = arith.constant dense<0.000000e+00> : vector<8xf32>
    %48 = vector.multi_reduction <add>, %47, %cst_23 [1] : vector<8x32xf32> to vector<8xf32>
    %49 = vector.shape_cast %48 : vector<8xf32> to vector<8x1xf32>
    %cst_24 = arith.constant 3.200000e+01 : f32
    %50 = vector.broadcast %cst_24 : f32 to vector<8x1xf32>
    %51 = arith.divf %49, %50 : vector<8x1xf32>
    %52 = vector.broadcast %44 : vector<8x1xf32> to vector<8x32xf32>
    %53 = arith.subf %38, %52 : vector<8x32xf32>
    %cst_25 = arith.constant 9.99999974E-6 : f32
    %54 = vector.broadcast %cst_25 : f32 to vector<8x1xf32>
    %55 = arith.addf %51, %54 : vector<8x1xf32>
    %56 = math.rsqrt %55 : vector<8x1xf32>
    %57 = vector.broadcast %56 : vector<8x1xf32> to vector<8x32xf32>
    %58 = arith.mulf %53, %57 : vector<8x32xf32>
    %59 = vector.broadcast %39 : vector<1x32xf32> to vector<8x32xf32>
    %60 = arith.mulf %58, %59 : vector<8x32xf32>
    %61 = vector.broadcast %40 : vector<1x32xf32> to vector<8x32xf32>
    %62 = arith.addf %60, %61 : vector<8x32xf32>
    %63 = arith.truncf %62 : vector<8x32xf32> to vector<8x32xbf16>
    %c0_26 = arith.constant 0 : index
    %c0_27 = arith.constant 0 : index
    %64 = vector.load %arg16[%c0_26, %c0_27] : memref<32x128xbf16, #tpu.memory_space<vmem>>, vector<32x128xbf16>
    %cst_28 = arith.constant dense<0.000000e+00> : vector<8x128xf32>
    %65 = tpu.matmul %63, %64, %cst_28 {dimension_numbers = #tpu.dot_dimension_numbers<[1], [0], [0], [1], [0, 0, 1, 1], [], []>} : vector<8x32xbf16>, vector<32x128xbf16>, vector<8x128xf32> -> vector<8x128xf32>
    %c0_29 = arith.constant 0 : index
    %c0_30 = arith.constant 0 : index
    %66 = vector.load %arg17[%c0_29, %c0_30] : memref<1x128xf32, #tpu.memory_space<vmem>>, vector<1x128xf32>
    %67 = vector.broadcast %66 : vector<1x128xf32> to vector<8x128xf32>
    %68 = arith.addf %65, %67 : vector<8x128xf32>
    %cst_31 = arith.constant 5.000000e-01 : f32
    %69 = vector.broadcast %cst_31 : f32 to vector<8x128xf32>
    %70 = arith.mulf %69, %68 : vector<8x128xf32>
    %cst_32 = arith.constant 0.707106769 : f32
    %71 = vector.broadcast %cst_32 : f32 to vector<8x128xf32>
    %72 = arith.mulf %68, %71 : vector<8x128xf32>
    %cst_33 = arith.constant 0.000000e+00 : f32
    %73 = vector.broadcast %cst_33 : f32 to vector<8x128xf32>
    %74 = arith.cmpf oge, %72, %73 : vector<8x128xf32>
    %cst_34 = arith.constant 1.000000e+00 : f32
    %cst_35 = arith.constant -1.000000e+00 : f32
    %75 = vector.broadcast %cst_34 : f32 to vector<8x128xf32>
    %76 = vector.broadcast %cst_35 : f32 to vector<8x128xf32>
    %77 = arith.select %74, %75, %76 : vector<8x128xi1>, vector<8x128xf32>
    %78 = math.absf %72 : vector<8x128xf32>
    %cst_36 = arith.constant 0.327591091 : f32
    %79 = vector.broadcast %cst_36 : f32 to vector<8x128xf32>
    %80 = arith.mulf %79, %78 : vector<8x128xf32>
    %cst_37 = arith.constant 1.000000e+00 : f32
    %81 = vector.broadcast %cst_37 : f32 to vector<8x128xf32>
    %82 = arith.addf %81, %80 : vector<8x128xf32>
    %83 = tpu.reciprocal %82 {approx = true} : vector<8x128xf32> -> vector<8x128xf32>
    %cst_38 = arith.constant 1.06140542 : f32
    %84 = vector.broadcast %cst_38 : f32 to vector<8x128xf32>
    %85 = arith.mulf %84, %83 : vector<8x128xf32>
    %cst_39 = arith.constant -1.45315206 : f32
    %86 = vector.broadcast %cst_39 : f32 to vector<8x128xf32>
    %87 = arith.addf %85, %86 : vector<8x128xf32>
    %88 = arith.mulf %87, %83 : vector<8x128xf32>
    %cst_40 = arith.constant 1.42141378 : f32
    %89 = vector.broadcast %cst_40 : f32 to vector<8x128xf32>
    %90 = arith.addf %88, %89 : vector<8x128xf32>
    %91 = arith.mulf %90, %83 : vector<8x128xf32>
    %cst_41 = arith.constant -0.284496725 : f32
    %92 = vector.broadcast %cst_41 : f32 to vector<8x128xf32>
    %93 = arith.addf %91, %92 : vector<8x128xf32>
    %94 = arith.mulf %93, %83 : vector<8x128xf32>
    %cst_42 = arith.constant 0.254829586 : f32
    %95 = vector.broadcast %cst_42 : f32 to vector<8x128xf32>
    %96 = arith.addf %94, %95 : vector<8x128xf32>
    %97 = arith.mulf %96, %83 : vector<8x128xf32>
    %cst_43 = arith.constant 0.000000e+00 : f32
    %98 = vector.broadcast %cst_43 : f32 to vector<8x128xf32>
    %99 = arith.subf %98, %78 : vector<8x128xf32>
    %100 = arith.mulf %99, %78 : vector<8x128xf32>
    %101 = math.exp %100 : vector<8x128xf32>
    %102 = arith.mulf %97, %101 : vector<8x128xf32>
    %cst_44 = arith.constant 1.000000e+00 : f32
    %103 = vector.broadcast %cst_44 : f32 to vector<8x128xf32>
    %104 = arith.subf %103, %102 : vector<8x128xf32>
    %105 = arith.mulf %77, %104 : vector<8x128xf32>
    %cst_45 = arith.constant 1.000000e+00 : f32
    %106 = vector.broadcast %cst_45 : f32 to vector<8x128xf32>
    %107 = arith.addf %106, %105 : vector<8x128xf32>
    %108 = arith.mulf %70, %107 : vector<8x128xf32>
    %109 = arith.truncf %108 : vector<8x128xf32> to vector<8x128xbf16>
    %c0_46 = arith.constant 0 : index
    %c0_47 = arith.constant 0 : index
    %110 = vector.load %arg18[%c0_46, %c0_47] : memref<128x32xbf16, #tpu.memory_space<vmem>>, vector<128x32xbf16>
    %cst_48 = arith.constant dense<0.000000e+00> : vector<8x32xf32>
    %111 = tpu.matmul %109, %110, %cst_48 {dimension_numbers = #tpu.dot_dimension_numbers<[1], [0], [0], [1], [0, 0, 1, 1], [], []>} : vector<8x128xbf16>, vector<128x32xbf16>, vector<8x32xf32> -> vector<8x32xf32>
    %c0_49 = arith.constant 0 : index
    %c0_50 = arith.constant 0 : index
    %112 = vector.load %arg19[%c0_49, %c0_50] : memref<1x32xf32, #tpu.memory_space<vmem>>, vector<1x32xf32>
    %113 = vector.broadcast %112 : vector<1x32xf32> to vector<8x32xf32>
    %114 = arith.addf %111, %113 : vector<8x32xf32>
    %c0_51 = arith.constant 0 : index
    %c0_52 = arith.constant 0 : index
    %c0_53 = arith.constant 0 : index
    %115 = vector.load %arg3[%c0_51, %c0_52, %c0_53] : memref<1x1x1xf32, #tpu.memory_space<vmem>>, vector<1x1x1xf32>
    %116 = vector.shape_cast %114 : vector<8x32xf32> to vector<1x8x32xf32>
    %117 = vector.broadcast %115 : vector<1x1x1xf32> to vector<1x8x32xf32>
    %118 = arith.mulf %117, %116 : vector<1x8x32xf32>
    %119 = arith.addf %37, %118 : vector<1x8x32xf32>
    %c0_54 = arith.constant 0 : index
    %c0_55 = arith.constant 0 : index
    %c0_56 = arith.constant 0 : index
    %120 = vector.load %arg20[%c0_54, %c0_55, %c0_56] : memref<1x8x32xf32, #tpu.memory_space<vmem>>, vector<1x8x32xf32>
    tpu.vector_store %arg20[%c0_54, %c0_55, %c0_56], %119 {strides = array<i32>} : memref<1x8x32xf32, #tpu.memory_space<vmem>>, vector<1x8x32xf32>,
    return
  }
  func.func @transform_0(%arg0: i32) -> (i32, i32, i32) {
    %c0_i32 = arith.constant 0 : i32
    %c0_i32_0 = arith.constant 0 : i32
    %c0_i32_1 = arith.constant 0 : i32
    return %arg0, %c0_i32, %c0_i32_0 : i32, i32, i32
  }
  func.func @transform_1(%arg0: i32) -> (i32, i32, i32) {
    %c0_i32 = arith.constant 0 : i32
    %c0_i32_0 = arith.constant 0 : i32
    %c0_i32_1 = arith.constant 0 : i32
    return %arg0, %c0_i32, %c0_i32_0 : i32, i32, i32
  }
  func.func @transform_2(%arg0: i32) -> (i32, i32, i32) {
    %c0_i32 = arith.constant 0 : i32
    %c0_i32_0 = arith.constant 0 : i32
    %c0_i32_1 = arith.constant 0 : i32
    return %arg0, %c0_i32, %c0_i32_0 : i32, i32, i32
  }
  func.func @transform_3(%arg0: i32) -> (i32, i32) {
    %c0_i32 = arith.constant 0 : i32
    %c0_i32_0 = arith.constant 0 : i32
    %c0_i32_1 = arith.constant 0 : i32
    return %c0_i32, %c0_i32_0 : i32, i32
  }
  func.func @transform_4(%arg0: i32) -> (i32, i32) {
    %c0_i32 = arith.constant 0 : i32
    %c0_i32_0 = arith.constant 0 : i32
    %c0_i32_1 = arith.constant 0 : i32
    return %c0_i32, %c0_i32_0 : i32, i32
  }
  func.func @transform_5(%arg0: i32) -> (i32, i32, i32) {
    %c0_i32 = arith.constant 0 : i32
    %c0_i32_0 = arith.constant 0 : i32
    %c0_i32_1 = arith.constant 0 : i32
    %c0_i32_2 = arith.constant 0 : i32
    return %c0_i32, %c0_i32_0, %c0_i32_1 : i32, i32, i32
  }
  func.func @transform_6(%arg0: i32) -> (i32, i32, i32) {
    %c0_i32 = arith.constant 0 : i32
    %c0_i32_0 = arith.constant 0 : i32
    %c0_i32_1 = arith.constant 0 : i32
    %c0_i32_2 = arith.constant 0 : i32
    return %c0_i32, %c0_i32_0, %c0_i32_1 : i32, i32, i32
  }
  func.func @transform_7(%arg0: i32) -> (i32, i32, i32) {
    %c0_i32 = arith.constant 0 : i32
    %c0_i32_0 = arith.constant 0 : i32
    %c0_i32_1 = arith.constant 0 : i32
    %c0_i32_2 = arith.constant 0 : i32
    return %c0_i32, %c0_i32_0, %c0_i32_1 : i32, i32, i32
  }
  func.func @transform_8(%arg0: i32) -> (i32, i32, i32) {
    %c0_i32 = arith.constant 0 : i32
    %c0_i32_0 = arith.constant 0 : i32
    %c0_i32_1 = arith.constant 0 : i32
    %c0_i32_2 = arith.constant 0 : i32
    return %c0_i32, %c0_i32_0, %c0_i32_1 : i32, i32, i32
  }
  func.func @transform_9(%arg0: i32) -> (i32, i32, i32) {
    %c0_i32 = arith.constant 0 : i32
    %c0_i32_0 = arith.constant 0 : i32
    %c0_i32_1 = arith.constant 0 : i32
    %c0_i32_2 = arith.constant 0 : i32
    return %c0_i32, %c0_i32_0, %c0_i32_1 : i32, i32, i32
  }
  func.func @transform_10(%arg0: i32) -> (i32, i32, i32) {
    %c0_i32 = arith.constant 0 : i32
    %c0_i32_0 = arith.constant 0 : i32
    %c0_i32_1 = arith.constant 0 : i32
    %c0_i32_2 = arith.constant 0 : i32
    return %c0_i32, %c0_i32_0, %c0_i32_1 : i32, i32, i32
  }
  func.func @transform_11(%arg0: i32) -> (i32, i32, i32) {
    %c0_i32 = arith.constant 0 : i32
    %c0_i32_0 = arith.constant 0 : i32
    %c0_i32_1 = arith.constant 0 : i32
    %c0_i32_2 = arith.constant 0 : i32
    return %c0_i32, %c0_i32_0, %c0_i32_1 : i32, i32, i32
  }
  func.func @transform_12(%arg0: i32) -> (i32, i32) {
    %c0_i32 = arith.constant 0 : i32
    %c0_i32_0 = arith.constant 0 : i32
    %c0_i32_1 = arith.constant 0 : i32
    return %c0_i32, %c0_i32_0 : i32, i32
  }
  func.func @transform_13(%arg0: i32) -> (i32, i32) {
    %c0_i32 = arith.constant 0 : i32
    %c0_i32_0 = arith.constant 0 : i32
    %c0_i32_1 = arith.constant 0 : i32
    return %c0_i32, %c0_i32_0 : i32, i32
  }
  func.func @transform_14(%arg0: i32) -> (i32, i32) {
    %c0_i32 = arith.constant 0 : i32
    %c0_i32_0 = arith.constant 0 : i32
    %c0_i32_1 = arith.constant 0 : i32
    return %c0_i32, %c0_i32_0 : i32, i32
  }
  func.func @transform_15(%arg0: i32) -> (i32, i32) {
    %c0_i32 = arith.constant 0 : i32
    %c0_i32_0 = arith.constant 0 : i32
    %c0_i32_1 = arith.constant 0 : i32
    return %c0_i32, %c0_i32_0 : i32, i32
  }
  func.func @transform_16(%arg0: i32) -> (i32, i32) {
    %c0_i32 = arith.constant 0 : i32
    %c0_i32_0 = arith.constant 0 : i32
    %c0_i32_1 = arith.constant 0 : i32
    return %c0_i32, %c0_i32_0 : i32, i32
  }
  func.func @transform_17(%arg0: i32) -> (i32, i32) {
    %c0_i32 = arith.constant 0 : i32
    %c0_i32_0 = arith.constant 0 : i32
    %c0_i32_1 = arith.constant 0 : i32
    return %c0_i32, %c0_i32_0 : i32, i32
  }
  func.func @transform_18(%arg0: i32) -> (i32, i32) {
    %c0_i32 = arith.constant 0 : i32
    %c0_i32_0 = arith.constant 0 : i32
    %c0_i32_1 = arith.constant 0 : i32
    return %c0_i32, %c0_i32_0 : i32, i32
  }
  func.func @transform_19(%arg0: i32) -> (i32, i32, i32) {
    %c0_i32 = arith.constant 0 : i32
    %c0_i32_0 = arith.constant 0 : i32
    %c0_i32_1 = arith.constant 0 : i32
    return %arg0, %c0_i32, %c0_i32_0 : i32, i32, i32
  }
}

</mosaic_0001>

<bundles_post_ra>
// kernel: tpu_custom_call.1
= control target key start
LH: loop header
LB: loop body
LE: loop exit
PB: predicated region body
PF: predicated region fallthrough
CT: control target
= control target key end

     0   :  { %s3826_s0 = inlined_call_operand.hbm [shape: f32[2,8,32], index: 0, kind: input, shape index: {}]   ;;  %s3827_s1 = inlined_call_operand.hbm [shape: f32[2,1,1], index: 1, kind: input, shape index: {}]   ;;  %s3828_s2 = inlined_call_operand.hbm [shape: f32[2,1,1], index: 2, kind: input, shape index: {}]   ;;  %s3829_s3 = inlined_call_operand.hbm [shape: f32[1,32], index: 3, kind: input, shape index: {}]   ;;  %s3830_s4 = inlined_call_operand.hbm [shape: f32[1,32], index: 4, kind: input, shape index: {}]   ;;  %s3831_s5 = inlined_call_operand.hbm [shape: bf16[4,32,8], index: 5, kind: input, shape index: {}]   ;;  %s3832_s6 = inlined_call_operand.hbm [shape: f32[4,1,8], index: 6, kind: input, shape index: {}]   ;;  %s3833_s7 = inlined_call_operand.hbm [shape: bf16[4,32,8], index: 7, kind: input, shape index: {}]   ;;  %s3834_s8 = inlined_call_operand.hbm [shape: f32[4,1,8], index: 8, kind: input, shape index: {}]   ;;  %s3835_s9 = inlined_call_operand.hbm [shape: bf16[4,32,8], index: 9, kind: input, shape index: {}]   ;;  %s3836_s10 = inlined_call_operand.hbm [shape: f32[4,1,8], index: 10, kind: input, shape index: {}]   ;;  %s3837_s11 = inlined_call_operand.hbm [shape: bf16[4,8,32], index: 11, kind: input, shape index: {}]   ;;  %s3838_s12 = inlined_call_operand.hbm [shape: f32[1,32], index: 12, kind: input, shape index: {}]   ;;  %s3839_s13 = inlined_call_operand.hbm [shape: f32[1,32], index: 13, kind: input, shape index: {}]   ;;  %s3840_s14 = inlined_call_operand.hbm [shape: f32[1,32], index: 14, kind: input, shape index: {}]   ;;  %s3841_s15 = inlined_call_operand.hbm [shape: bf16[32,128], index: 15, kind: input, shape index: {}]   ;;  %s3842_s16 = inlined_call_operand.hbm [shape: f32[1,128], index: 16, kind: input, shape index: {}]   ;;  %s3843_s17 = inlined_call_operand.hbm [shape: bf16[128,32], index: 17, kind: input, shape index: {}]   ;;  %s3844_s18 = inlined_call_operand.hbm [shape: f32[1,32], index: 18, kind: input, shape index: {}]   ;;  %s3845_s19 = inlined_call_operand.hbm [shape: f32[2,8,32], index: 19, kind: output, shape index: {}]  }
   0x1   :  { %3875 = sst [smem:[#allocation49_spill]] %s3826_s0 }
   0x2   :  { %3876 = sst [smem:[#allocation50_spill]] %s3827_s1 }
   0x3   :  { %3877 = sst [smem:[#allocation51_spill]] %s3828_s2 }
   0x4   :  { %3878 = sst [smem:[#allocation52_spill]] %s3829_s3 }
   0x5   :  { %3879 = sst [smem:[#allocation53_spill]] %s3830_s4 }
   0x6   :  { %3880 = sst [smem:[#allocation54_spill]] %s3831_s5 }
   0x7   :  { %3881 = sst [smem:[#allocation55_spill]] %s3832_s6 }
   0x8   :  { %3882 = sst [smem:[#allocation56_spill]] %s3833_s7 }
   0x9   :  { %3883 = sst [smem:[#allocation57_spill]] %s3834_s8 }
   0xa   :  { %3884 = sst [smem:[#allocation58_spill]] %s3835_s9 }
   0xb   :  { %3885 = sst [smem:[#allocation59_spill]] %s3836_s10 }
   0xc   :  { %3886 = sst [smem:[#allocation60_spill]] %s3837_s11 }
   0xd   :  { %3887 = sst [smem:[#allocation61_spill]] %s3838_s12 }
   0xe   :  { %3888 = sst [smem:[#allocation62_spill]] %s3839_s13 }
   0xf   :  { %3889 = sst [smem:[#allocation63_spill]] %s3840_s14 }
  0x10   :  { %3890 = sst [smem:[#allocation64_spill]] %s3841_s15 }
  0x11   :  { %3891 = sst [smem:[#allocation65_spill]] %s3842_s16 }
  0x12   :  { %3892 = sst [smem:[#allocation66_spill]] %s3843_s17 }
  0x13   :  { %3893 = sst [smem:[#allocation67_spill]] %s3844_s18 }
  0x14   :  { %3894 = sst [smem:[#allocation68_spill]] %s3845_s19 }
  0x15   :  { %24 = vsyncpa [#allocation3], 0 }
  0x16   :  { %26 = vsyncpa [#allocation3 + $0x1], 0 }
  0x17   :  { %27 = vsyncpa [#allocation6], 0 }
  0x18   :  { %29 = vsyncpa [#allocation6 + $0x1], 0 }
  0x19   :  { %30 = vsyncpa [#allocation9], 0 }
  0x1a   :  { %31 = vsyncpa [#allocation12], 0 }
  0x1b   :  { %32 = vsyncpa [#allocation15], 0 }
  0x1c   :  { %33 = vsyncpa [#allocation18], 0 }
  0x1d   :  { %34 = vsyncpa [#allocation21], 0 }
  0x1e   :  { %35 = vsyncpa [#allocation24], 0 }
  0x1f   :  { %36 = vsyncpa [#allocation27], 0 }
  0x20   :  { %37 = vsyncpa [#allocation30], 0 }
  0x21   :  { %38 = vsyncpa [#allocation4], 0 }
  0x22   :  { %40 = vsyncpa [#allocation4 + $0x1], 0  ;;  %s3111_s0 = smov 0   ;;  %s3113_s30 = smov 0  }
  0x23   :  { %s3115_s20 = smov 0   ;;  %s3117_s21 = smov 0  }
  0x24 LB: > { %3895 = sst [smem:[#allocation44_spill]] %s2967_s20  ;;  %s2981_s1 = smov [#allocation8]   ;;  %s2971_s21 = sphi %s3117_s21, %s3959_s21   ;;  %s2967_s20 = sphi %s3115_s20, %s3961_s20   ;;  %s2963_s30 = sphi %s3113_s30, %s3963_s30   ;;  %s2959_s0 = sphi %s3111_s0, %s3962_s0  }
  0x25   : > { %s504_s22 = sshll.u32 %s2981_s1, 4  ;;  %s3132_s2 = sadd.s32 4294967295, %s2971_s21   ;;  %s3137_s22 = int_to_ptr.vmem [resolvable:$true] %s504_s22 }
  0x26   : > { %p1865_p0 = scmp.ge.s32.totalorder %s2971_s21, 1  ;;  %p3858_p1 = scmp.eq.s32.totalorder %s3132_s2, 0 }
  0x27   : > { %p491_p2 = scmp.lt.s32.totalorder %s2971_s21, 3  ;;  %s2982_s24 = smov [#allocation11]  }
  0x28   : > { %s525_s25 = sshll.u32 %s2982_s24, 4  ;;  %s2983_s26 = smov [#allocation14]   ;;  %s3146_s25 = int_to_ptr.vmem [resolvable:$true] %s525_s25 }
  0x29   : > { %p3139_p3 = pnand %p1865_p0, %p491_p2  ;;  %s551_s27 = sshll.u32 %s2983_s26, 4  ;;  %s3154_s27 = int_to_ptr.vmem [resolvable:$true] %s551_s27 }
  0x2a   : > { %s3899_s1 = sld [smem:[#allocation52_spill]] }
  0x2b   : > { %s3896_s23 = scalar_select %p3139_p3, 1, 0 }
  0x2c   : > { %p2122_p5 = pneg %p3139_p3 }
  0x2d   : > { %3897 = sst [smem:[#allocation45_spill]] %s3896_s23 }
  0x2e   : > { %p3150_p6 = pnand %p2122_p5, %p3858_p1 }
  0x30   : > { %s3898_s3 = scalar_select %p3150_p6, 1, 0 }
  0x31   : > { %s2323_s19 = scalar_lea.hbm %s3899_s1, 16  ;;  %p3164_p8 = pneg %p3150_p6 }
  0x32   : > { %p2324_p7 = scmp.ne.s32.totalorder %s3899_s1, %s2323_s19  ;;  %p2330_p11 = scmp.lt.u32.totalorder %s2323_s19, %s3899_s1 }
  0x33   : > { %s3900_s24 = scalar_select %p3164_p8, 1, 0 }
  0x34   : > { %p2326_p9 = pnand %p3164_p8, %p2324_p7 }
  0x36   : > { %p2327_p10 = pneg %p2326_p9 }
  0x38   : > { %p2332_p12 = pnand %p2330_p11, %p2327_p10 }
  0x3a   : > { %2335 = shalt.err (!%p2332_p12)
}
  0x3b   : > { %s2336_s18 = scalar_lea.vmem %s3137_s22, 16  ;;  %s2343_s23 = scalar_lea.vmem %s3137_s22, 32 }
  0x3c   : > { %p2337_p13 = scmp.ne.s32.totalorder %s3137_s22, %s2336_s18  ;;  %p2344_p5 = scmp.lt.s32.totalorder %s3137_s22, %s3137_s22 }
  0x3d   : > { %p2345_p7 = scmp.lt.s32.totalorder %s2343_s23, %s2336_s18 }
  0x3e   : > { %p2339_p0 = pnand %p2337_p13, %p3164_p8 }
  0x3f   : > { %p2346_p9 = por %p2345_p7, %p2344_p5 }
  0x40   : > { %p2340_p2 = pneg %p2339_p0 }
  0x42   : > { %p2347_p4 = pnand %p2346_p9, %p2340_p2 }
  0x44   : > { %2350 = shalt.err (!%p2347_p4)
}
  0x45   : > { %2125 = dma.hbm_to_vmem [thread:$0]  (!%p3150_p6), %s3899_s1, 16, %s3137_s22, [#allocation9]  }
  0x46   : > { %s3901_s5 = sld [smem:[#allocation54_spill]] }
  0x4c   : > { %s2351_s26 = scalar_lea.hbm %s3901_s5, 1024 }
  0x4d   : > { %p2352_p10 = scmp.ne.s32.totalorder %s3901_s5, %s2351_s26  ;;  %p2358_p4 = scmp.lt.u32.totalorder %s2351_s26, %s3901_s5 }
  0x4f   : > { %p2354_p11 = pnand %p2352_p10, %p3164_p8 }
  0x51   : > { %p2355_p12 = pneg %p2354_p11 }
  0x53   : > { %p2360_p13 = pnand %p2358_p4, %p2355_p12 }
  0x55   : > { %2363 = shalt.err (!%p2360_p13)
}
  0x56   : > { %s2364_s22 = scalar_lea.vmem %s3146_s25, 1024  ;;  %p2372_p7 = scmp.lt.s32.totalorder %s3146_s25, %s3146_s25 }
  0x57   : > { %p2365_p0 = scmp.ne.s32.totalorder %s3146_s25, %s2364_s22  ;;  %p2373_p9 = scmp.lt.s32.totalorder %s2364_s22, %s2364_s22 }
  0x59   : > { %p2367_p2 = pnand %p2365_p0, %p3164_p8  ;;  %p2374_p10 = por %p2373_p9, %p2372_p7 }
  0x5b   : > { %p2368_p5 = pneg %p2367_p2 }
  0x5d   : > { %p2375_p11 = pnand %p2374_p10, %p2368_p5 }
  0x5f   : > { %2378 = shalt.err (!%p2375_p11)
}
  0x60   : > { %s2984_s12 = smov 64   ;;  %s2985_s14 = smov 4  }
  0x61   : > { %2131 = dma.hbm_to_vmem [thread:$0]  (!%p3150_p6), %s3901_s5, 1024, %s3146_s25, [#allocation12], %s2984_s12, %s2984_s12, %s2985_s14  }
  0x62   : > { %s3902_s7 = sld [smem:[#allocation56_spill]] }
  0x68   : > { %s2379_s26 = scalar_lea.hbm %s3902_s7, 1024 }
  0x69   : > { %p2380_p12 = scmp.ne.s32.totalorder %s3902_s7, %s2379_s26  ;;  %p2386_p0 = scmp.lt.u32.totalorder %s2379_s26, %s3902_s7 }
  0x6b   : > { %p2382_p4 = pnand %p2380_p12, %p3164_p8 }
  0x6d   : > { %p2383_p13 = pneg %p2382_p4 }
  0x6f   : > { %p2388_p2 = pnand %p2386_p0, %p2383_p13 }
  0x71   : > { %2391 = shalt.err (!%p2388_p2)
}
  0x72   : > { %s2392_s25 = scalar_lea.vmem %s3154_s27, 1024  ;;  %p2400_p10 = scmp.lt.s32.totalorder %s3154_s27, %s3154_s27 }
  0x73   : > { %p2393_p5 = scmp.ne.s32.totalorder %s3154_s27, %s2392_s25  ;;  %p2401_p11 = scmp.lt.s32.totalorder %s2392_s25, %s2392_s25 }
  0x75   : > { %p2395_p7 = pnand %p2393_p5, %p3164_p8  ;;  %p2402_p12 = por %p2401_p11, %p2400_p10 }
  0x77   : > { %p2396_p9 = pneg %p2395_p7 }
  0x79   : > { %p2403_p4 = pnand %p2402_p12, %p2396_p9 }
  0x7b   : > { %2406 = shalt.err (!%p2403_p4)
}
  0x7c   : > { %2137 = dma.hbm_to_vmem [thread:$0]  (!%p3150_p6), %s3902_s7, 1024, %s3154_s27, [#allocation15], %s2984_s12, %s2984_s12, %s2985_s14  }
  0x7d   : > { %s2986_s19 = smov [#allocation17]   ;;  %s2987_s29 = smov [#allocation20]  }
  0x7e   : > { %s577_s28 = sshll.u32 %s2986_s19, 4  ;;  %s603_s26 = sshll.u32 %s2987_s29, 4  ;;  %s578_s28 = int_to_ptr.vmem [resolvable:$true] %s577_s28  ;;  %s604_s26 = int_to_ptr.vmem [resolvable:$true] %s603_s26 }
  0x7f   : > { %s3903_s9 = sld [smem:[#allocation58_spill]] }
  0x85   : > { %s2407_s22 = scalar_lea.hbm %s3903_s9, 1024 }
  0x86   : > { %p2408_p13 = scmp.ne.s32.totalorder %s3903_s9, %s2407_s22  ;;  %p2414_p5 = scmp.lt.u32.totalorder %s2407_s22, %s3903_s9 }
  0x88   : > { %p2410_p0 = pnand %p2408_p13, %p3164_p8 }
  0x8a   : > { %p2411_p2 = pneg %p2410_p0 }
  0x8c   : > { %p2416_p7 = pnand %p2414_p5, %p2411_p2 }
  0x8e   : > { %2419 = shalt.err (!%p2416_p7)
}
  0x8f   : > { %s2420_s27 = scalar_lea.vmem %s578_s28, 1024  ;;  %p2428_p12 = scmp.lt.s32.totalorder %s578_s28, %s578_s28 }
  0x90   : > { %p2421_p9 = scmp.ne.s32.totalorder %s578_s28, %s2420_s27  ;;  %p2429_p4 = scmp.lt.s32.totalorder %s2420_s27, %s2420_s27 }
  0x92   : > { %p2423_p10 = pnand %p2421_p9, %p3164_p8  ;;  %p2430_p1 = por %p2429_p4, %p2428_p12 }
  0x94   : > { %p2424_p11 = pneg %p2423_p10 }
  0x96   : > { %p2431_p3 = pnand %p2430_p1, %p2424_p11 }
  0x98   : > { %2434 = shalt.err (!%p2431_p3)
}
  0x99   : > { %2143 = dma.hbm_to_vmem [thread:$0]  (!%p3150_p6), %s3903_s9, 1024, %s578_s28, [#allocation18], %s2984_s12, %s2984_s12, %s2985_s14  }
  0x9a   : > { %s3904_s11 = sld [smem:[#allocation60_spill]] }
  0xa0   : > { %s2435_s29 = scalar_lea.hbm %s3904_s11, 256 }
  0xa1   : > { %p2436_p1 = scmp.ne.s32.totalorder %s3904_s11, %s2435_s29  ;;  %p2442_p0 = scmp.lt.u32.totalorder %s2435_s29, %s3904_s11 }
  0xa3   : > { %p2438_p3 = pnand %p2436_p1, %p3164_p8 }
  0xa5   : > { %p2439_p13 = pneg %p2438_p3 }
  0xa7   : > { %p2444_p2 = pnand %p2442_p0, %p2439_p13 }
  0xa9   : > { %2447 = shalt.err (!%p2444_p2)
}
  0xaa   : > { %s2448_s1 = scalar_lea.vmem %s604_s26, 256  ;;  %p2456_p10 = scmp.lt.s32.totalorder %s604_s26, %s604_s26 }
  0xab   : > { %p2449_p5 = scmp.ne.s32.totalorder %s604_s26, %s2448_s1  ;;  %p2457_p11 = scmp.lt.s32.totalorder %s2448_s1, %s2448_s1 }
  0xad   : > { %p2451_p7 = pnand %p2449_p5, %p3164_p8  ;;  %p2458_p12 = por %p2457_p11, %p2456_p10 }
  0xaf   : > { %p2452_p9 = pneg %p2451_p7 }
  0xb1   : > { %p2459_p4 = pnand %p2458_p12, %p2452_p9 }
  0xb3   : > { %2462 = shalt.err (!%p2459_p4)
}
  0xb4   : > { %2149 = dma.hbm_to_vmem [thread:$0]  (!%p3150_p6), %s3904_s11, 256, %s604_s26, [#allocation21], %s2984_s12, %s2984_s12, %s2985_s14  }
  0xb5   : > { %s2988_s5 = smov [#allocation23]   ;;  %s2989_s16 = smov [#allocation26]  }
  0xb6   : > { %s628_s10 = sshll.u32 %s2988_s5, 4  ;;  %s649_s19 = sshll.u32 %s2989_s16, 4  ;;  %s629_s10 = int_to_ptr.vmem [resolvable:$true] %s628_s10  ;;  %s650_s19 = int_to_ptr.vmem [resolvable:$true] %s649_s19 }
  0xb7   : > { %s3905_s13 = sld [smem:[#allocation62_spill]] }
  0xbd   : > { %s2463_s23 = scalar_lea.hbm %s3905_s13, 16 }
  0xbe   : > { %p2464_p1 = scmp.ne.s32.totalorder %s3905_s13, %s2463_s23  ;;  %p2470_p0 = scmp.lt.u32.totalorder %s2463_s23, %s3905_s13 }
  0xc0   : > { %p2466_p3 = pnand %p2464_p1, %p3164_p8 }
  0xc2   : > { %p2467_p13 = pneg %p2466_p3 }
  0xc4   : > { %p2472_p2 = pnand %p2470_p0, %p2467_p13 }
  0xc6   : > { %2475 = shalt.err (!%p2472_p2)
}
  0xc7   : > { %s2476_s26 = scalar_lea.vmem %s629_s10, 16  ;;  %s2483_s27 = scalar_lea.vmem %s629_s10, 32 }
  0xc8   : > { %p2477_p5 = scmp.ne.s32.totalorder %s629_s10, %s2476_s26  ;;  %p2484_p10 = scmp.lt.s32.totalorder %s629_s10, %s629_s10 }
  0xc9   : > { %p2485_p11 = scmp.lt.s32.totalorder %s2483_s27, %s2476_s26 }
  0xca   : > { %p2479_p7 = pnand %p2477_p5, %p3164_p8 }
  0xcb   : > { %p2486_p12 = por %p2485_p11, %p2484_p10 }
  0xcc   : > { %p2480_p9 = pneg %p2479_p7 }
  0xce   : > { %p2487_p4 = pnand %p2486_p12, %p2480_p9 }
  0xd0   : > { %2490 = shalt.err (!%p2487_p4)
}
  0xd1   : > { %2155 = dma.hbm_to_vmem [thread:$0]  (!%p3150_p6), %s3905_s13, 16, %s629_s10, [#allocation24]  }
  0xd2   : > { %s3906_s15 = sld [smem:[#allocation64_spill]] }
  0xd8   : > { %s2491_s23 = scalar_lea.hbm %s3906_s15, 256 }
  0xd9   : > { %p2492_p1 = scmp.ne.s32.totalorder %s3906_s15, %s2491_s23  ;;  %p2498_p0 = scmp.lt.u32.totalorder %s2491_s23, %s3906_s15 }
  0xdb   : > { %p2494_p3 = pnand %p2492_p1, %p3164_p8 }
  0xdd   : > { %p2495_p13 = pneg %p2494_p3 }
  0xdf   : > { %p2500_p2 = pnand %p2498_p0, %p2495_p13 }
  0xe1   : > { %2503 = shalt.err (!%p2500_p2)
}
  0xe2   : > { %s2504_s26 = scalar_lea.vmem %s650_s19, 256  ;;  %p2512_p10 = scmp.lt.s32.totalorder %s650_s19, %s650_s19 }
  0xe3   : > { %p2505_p5 = scmp.ne.s32.totalorder %s650_s19, %s2504_s26  ;;  %p2513_p11 = scmp.lt.s32.totalorder %s2504_s26, %s2504_s26 }
  0xe5   : > { %p2507_p7 = pnand %p2505_p5, %p3164_p8  ;;  %p2514_p12 = por %p2513_p11, %p2512_p10 }
  0xe7   : > { %p2508_p9 = pneg %p2507_p7 }
  0xe9   : > { %p2515_p4 = pnand %p2514_p12, %p2508_p9 }
  0xeb   : > { %2518 = shalt.err (!%p2515_p4)
}
  0xec   : > { %2161 = dma.hbm_to_vmem [thread:$0]  (!%p3150_p6), %s3906_s15, 256, %s650_s19, [#allocation27], %s2984_s12, %s2984_s12, %s2985_s14  }
  0xed   : > { %s2990_s5 = smov [#allocation29]   ;;  %s3907_s17 = sld [smem:[#allocation66_spill]] }
  0xee   : > { %s673_s16 = sshll.u32 %s2990_s5, 4  ;;  %s674_s16 = int_to_ptr.vmem [resolvable:$true] %s673_s16 }
  0xf3   : > { %s2519_s23 = scalar_lea.hbm %s3907_s17, 1024 }
  0xf4   : > { %p2520_p1 = scmp.ne.s32.totalorder %s3907_s17, %s2519_s23  ;;  %p2526_p0 = scmp.lt.u32.totalorder %s2519_s23, %s3907_s17 }
  0xf6   : > { %p2522_p3 = pnand %p2520_p1, %p3164_p8 }
  0xf8   : > { %p2523_p13 = pneg %p2522_p3 }
  0xfa   : > { %p2528_p2 = pnand %p2526_p0, %p2523_p13 }
  0xfc   : > { %2531 = shalt.err (!%p2528_p2)
}
  0xfd   : > { %s2532_s19 = scalar_lea.vmem %s674_s16, 1024  ;;  %p2540_p10 = scmp.lt.s32.totalorder %s674_s16, %s674_s16 }
  0xfe   : > { %p2533_p5 = scmp.ne.s32.totalorder %s674_s16, %s2532_s19  ;;  %p2541_p11 = scmp.lt.s32.totalorder %s2532_s19, %s2532_s19 }
 0x100   : > { %p2535_p7 = pnand %p2533_p5, %p3164_p8  ;;  %p2542_p12 = por %p2541_p11, %p2540_p10 }
 0x102   : > { %p2536_p9 = pneg %p2535_p7 }
 0x104   : > { %p2543_p4 = pnand %p2542_p12, %p2536_p9 }
 0x106   : > { %2546 = shalt.err (!%p2543_p4)
}
 0x107   : > { %2167 = dma.hbm_to_vmem [thread:$0]  (!%p3150_p6), %s3907_s17, 1024, %s674_s16, [#allocation30], %s2984_s12, %s2984_s12, %s2985_s14  }
 0x108   : > { %s1864_s27 = sadd.s32 4294967294, %s2971_s21   ;;  %s3342_s5 = sadd.s32 1, %s2971_s21  }
 0x109   : > { %3908 = sst [smem:[#allocation46_spill]] %s3342_s5  ;;  %s50_s29 = ssub.s32 %s2971_s21, %s3342_s5 }
 0x10a   : > { %s53_s18 = sadd.s32 1, %s2967_s20  ;;  %p51_p1 = scmp.eq.s32.totalorder %s50_s29, 0 }
 0x10b   : > { %p60_p3 = scmp.ne.s32.totalorder %s2967_s20, %s2963_s30  ;;  %p61_p13 = scmp.eq.s32.totalorder %s2971_s21, 0 }
 0x10c   : > { %p66_p0 = scmp.ne.s32.totalorder %s2963_s30, %s2959_s0  ;;  %p3910_p5 = scmp.eq.s32.totalorder %s3132_s2, 0 }
 0x10d   : > { %s3353_s23 = scalar_select %p51_p1, %s2967_s20, %s53_s18  }
 0x10e   : > { %p62_p2 = por %p61_p13, %p60_p3  ;;  %p3357_p7 = por %p3910_p5, %p66_p0 }
 0x10f   : > { %3909 = sst [smem:[#allocation47_spill]] %s3353_s23  ;;  %p478_p9 = scmp.eq.s32.totalorder %s3132_s2, 1 }
 0x110   : > { %s3911_s22 = scalar_select %p3357_p7, 1, 0 }
 0x111   : > { %p484_p10 = scmp.eq.s32.totalorder %s1864_s27, 1  ;;  %p2201_p11 = scmp.lt.s32.totalorder %s2971_s21, 2 }
 0x112   : > { %s3364_s12 = sand.u32 1, %s2967_s20   ;;  %p3366_p12 = por %p478_p9, %p60_p3 }
 0x113   : > { %p3370_p4 = por %p484_p10, %p66_p0  ;;  %p3374_p1 = pnand %p2201_p11, %p62_p2 }
 0x114   : > { %s3912_s14 = scalar_select %p3366_p12, 1, 0 }
 0x115   : > { %s3913_s16 = scalar_select %p3370_p4, 1, 0 }
 0x116   : > { %s3915_s25 = scalar_select %p3374_p1, 1, 0 }
 0x117   : > { %3914 = sst [smem:[#allocation48_spill]] %s3913_s16  ;;  %s716_s1 = sand.u32 1, %s2971_s21  }
 0x118   : > { %s1885_s28 = sshll.u32 %s2971_s21, 4  ;;  %s3916_s10 = sld [smem:[#allocation50_spill]] }
 0x119   : > { %s719_s29 = scalar_lea.vmem [#allocation5], %s3364_s12  ;;  %s3917_s11 = sld [smem:[#allocation51_spill]] }
 0x11a   : > { %s726_s18 = sshll.u32 %s719_s29, 4  ;;  %s3393_s15 = scalar_lea.sflag [#allocation6], %s716_s1  ;;  %s3386_s18 = int_to_ptr.vmem [resolvable:$true] %s726_s18 }
 0x11b   : > { %p3399_p13 = pneg %p3374_p1 }
 0x11d   : > { %s3918_s19 = scalar_select %p3399_p13, 1, 0 }
 0x11e   : > { %s3383_s27 = scalar_lea.hbm %s3916_s10, %s1885_s28  ;;  %s2552_s23 = scalar_lea.hbm %s3916_s10, 32 }
 0x11f   : > { %s3391_s13 = scalar_lea.hbm %s3917_s11, %s1885_s28  ;;  %s2547_s17 = scalar_lea.hbm %s3383_s27, 16 }
 0x120   : > { %p2548_p3 = scmp.ne.s32.totalorder %s3383_s27, %s2547_s17  ;;  %p2553_p5 = scmp.lt.u32.totalorder %s3383_s27, %s3916_s10 }
 0x121   : > { %p2554_p9 = scmp.lt.u32.totalorder %s2552_s23, %s2547_s17  ;;  %p2556_p11 = scmp.lt.u32.totalorder %s2547_s17, %s3383_s27 }
 0x122   : > { %p2550_p0 = pnand %p3399_p13, %p2548_p3 }
 0x123   : > { %p2555_p10 = por %p2554_p9, %p2553_p5 }
 0x124   : > { %p2551_p2 = pneg %p2550_p0 }
 0x125   : > { %p2557_p4 = por %p2556_p11, %p2555_p10 }
 0x127   : > { %p2558_p12 = pnand %p2557_p4, %p2551_p2 }
 0x129   : > { %2561 = shalt.err (!%p2558_p12)
}
 0x12a   : > { %s2562_s1 = scalar_lea.vmem %s3386_s18, 16  ;;  %s2991_s28 = smov [#allocation5]  }
 0x12b   : > { %p2563_p3 = scmp.ne.s32.totalorder %s3386_s18, %s2562_s1  ;;  %s2567_s26 = sshll.u32 %s2991_s28, 4  ;;  %s2568_s26 = int_to_ptr.vmem [resolvable:$false] %s2567_s26 }
 0x12c   : > { %s2569_s29 = scalar_lea.vmem %s2568_s26, 32  ;;  %p2570_p6 = scmp.lt.s32.totalorder %s3386_s18, %s2568_s26 }
 0x12d   : > { %p2565_p0 = pnand %p2563_p3, %p3399_p13  ;;  %p2571_p8 = scmp.lt.s32.totalorder %s2569_s29, %s2562_s1 }
 0x12f   : > { %p2566_p7 = pneg %p2565_p0  ;;  %p2572_p5 = por %p2571_p8, %p2570_p6 }
 0x131   : > { %p2573_p9 = pnand %p2572_p5, %p2566_p7 }
 0x133   : > { %2576 = shalt.err (!%p2573_p9)
}
 0x134   : > { %2177 = dma.hbm_to_vmem [thread:$0]  (!%p3374_p1), %s3383_s27, 16, %s3386_s18, %s3393_s15  }
 0x135   : > { %s2992_s17 = smov [#allocation10]   ;;  %s2993_s7 = smov [#allocation13]  }
 0x136   : > { %s515_s23 = sshll.u32 %s2992_s17, 4  ;;  %s538_s9 = sshll.u32 %s2993_s7, 4  ;;  %s516_s23 = int_to_ptr.vmem [resolvable:$true] %s515_s23  ;;  %s3423_s9 = int_to_ptr.vmem [resolvable:$true] %s538_s9 }
 0x137   : > { %s3919_s4 = sld [smem:[#allocation53_spill]]  ;;  %p3920_p8 = scmp.ne.s32.totalorder %s3900_s24, 0 }
 0x13d   : > { %s2577_s1 = scalar_lea.hbm %s3919_s4, 16 }
 0x13e   : > { %p2578_p6 = scmp.ne.s32.totalorder %s3919_s4, %s2577_s1  ;;  %p2584_p4 = scmp.lt.u32.totalorder %s2577_s1, %s3919_s4 }
 0x140   : > { %p2580_p7 = pnand %p2578_p6, %p3920_p8 }
 0x142   : > { %p2581_p12 = pneg %p2580_p7 }
 0x144   : > { %p2586_p2 = pnand %p2584_p4, %p2581_p12 }
 0x146   : > { %2589 = shalt.err (!%p2586_p2)
}
 0x147   : > { %s2590_s18 = scalar_lea.vmem %s516_s23, 16  ;;  %s2597_s17 = scalar_lea.vmem %s516_s23, 32 }
 0x148   : > { %p2591_p10 = scmp.ne.s32.totalorder %s516_s23, %s2590_s18  ;;  %p2598_p0 = scmp.lt.s32.totalorder %s516_s23, %s516_s23 }
 0x149   : > { %p2599_p5 = scmp.lt.s32.totalorder %s2597_s17, %s2590_s18 }
 0x14a   : > { %p2593_p11 = pnand %p2591_p10, %p3920_p8 }
 0x14b   : > { %p2600_p9 = por %p2599_p5, %p2598_p0 }
 0x14c   : > { %p2594_p3 = pneg %p2593_p11 }
 0x14e   : > { %p2601_p1 = pnand %p2600_p9, %p2594_p3 }
 0x150   : > { %2604 = shalt.err (!%p2601_p1)
}
 0x151   : > { %p3921_p6 = scmp.ne.s32.totalorder %s3898_s3, 0  ;;  %s3922_s6 = sld [smem:[#allocation55_spill]] }
 0x153   : > { %2128 = dma.hbm_to_vmem [thread:$0]  (!%p3921_p6), %s3919_s4, 16, %s516_s23, [#allocation9]  }
 0x157   : > { %s2605_s26 = scalar_lea.hbm %s3922_s6, 64 }
 0x158   : > { %p2606_p7 = scmp.ne.s32.totalorder %s3922_s6, %s2605_s26  ;;  %p2612_p1 = scmp.lt.u32.totalorder %s2605_s26, %s3922_s6 }
 0x15a   : > { %p2608_p12 = pnand %p2606_p7, %p3920_p8 }
 0x15c   : > { %p2609_p4 = pneg %p2608_p12 }
 0x15e   : > { %p2614_p2 = pnand %p2612_p1, %p2609_p4 }
 0x160   : > { %2617 = shalt.err (!%p2614_p2)
}
 0x161   : > { %s2618_s23 = scalar_lea.vmem %s3423_s9, 64  ;;  %p2626_p0 = scmp.lt.s32.totalorder %s3423_s9, %s3423_s9 }
 0x162   : > { %p2619_p10 = scmp.ne.s32.totalorder %s3423_s9, %s2618_s23  ;;  %p2627_p5 = scmp.lt.s32.totalorder %s2618_s23, %s2618_s23 }
 0x164   : > { %p2621_p11 = pnand %p2619_p10, %p3920_p8  ;;  %p2628_p9 = por %p2627_p5, %p2626_p0 }
 0x166   : > { %p2622_p3 = pneg %p2621_p11 }
 0x168   : > { %p2629_p7 = pnand %p2628_p9, %p2622_p3 }
 0x16a   : > { %2632 = shalt.err (!%p2629_p7)
}
 0x16b   : > { %s2994_s17 = smov 16   ;;  %s2995_s10 = smov 1  }
 0x16c   : > { %2134 = dma.hbm_to_vmem [thread:$0]  (!%p3921_p6), %s3922_s6, 64, %s3423_s9, [#allocation12], %s2994_s17, %s2994_s17, %s2995_s10  }
 0x16d   : > { %s2996_s28 = smov [#allocation16]   ;;  %s2997_s1 = smov [#allocation19]  }
 0x16e   : > { %s564_s26 = sshll.u32 %s2996_s28, 4  ;;  %s590_s29 = sshll.u32 %s2997_s1, 4  ;;  %s565_s26 = int_to_ptr.vmem [resolvable:$true] %s564_s26  ;;  %s3469_s29 = int_to_ptr.vmem [resolvable:$true] %s590_s29 }
 0x16f   : > { %s3923_s8 = sld [smem:[#allocation57_spill]] }
 0x175   : > { %s2633_s23 = scalar_lea.hbm %s3923_s8, 64 }
 0x176   : > { %p2634_p12 = scmp.ne.s32.totalorder %s3923_s8, %s2633_s23  ;;  %p2640_p2 = scmp.lt.u32.totalorder %s2633_s23, %s3923_s8 }
 0x178   : > { %p2636_p4 = pnand %p2634_p12, %p3920_p8 }
 0x17a   : > { %p2637_p1 = pneg %p2636_p4 }
 0x17c   : > { %p2642_p10 = pnand %p2640_p2, %p2637_p1 }
 0x17e   : > { %2645 = shalt.err (!%p2642_p10)
}
 0x17f   : > { %s2646_s20 = scalar_lea.vmem %s565_s26, 64  ;;  %p2654_p5 = scmp.lt.s32.totalorder %s565_s26, %s565_s26 }
 0x180   : > { %p2647_p11 = scmp.ne.s32.totalorder %s565_s26, %s2646_s20  ;;  %p2655_p9 = scmp.lt.s32.totalorder %s2646_s20, %s2646_s20 }
 0x182   : > { %p2649_p3 = pnand %p2647_p11, %p3920_p8  ;;  %p2656_p7 = por %p2655_p9, %p2654_p5 }
 0x184   : > { %p2650_p0 = pneg %p2649_p3 }
 0x186   : > { %p2657_p13 = pnand %p2656_p7, %p2650_p0 }
 0x188   : > { %2660 = shalt.err (!%p2657_p13)
}
 0x189   : > { %2140 = dma.hbm_to_vmem [thread:$0]  (!%p3921_p6), %s3923_s8, 64, %s565_s26, [#allocation15], %s2994_s17, %s2994_s17, %s2995_s10  }
 0x18a   : > { %s3924_s27 = sld [smem:[#allocation59_spill]] }
 0x190   : > { %s2661_s18 = scalar_lea.hbm %s3924_s27, 64 }
 0x191   : > { %p2662_p12 = scmp.ne.s32.totalorder %s3924_s27, %s2661_s18  ;;  %p2668_p1 = scmp.lt.u32.totalorder %s2661_s18, %s3924_s27 }
 0x193   : > { %p2664_p13 = pnand %p2662_p12, %p3920_p8 }
 0x195   : > { %p2665_p4 = pneg %p2664_p13 }
 0x197   : > { %p2670_p2 = pnand %p2668_p1, %p2665_p4 }
 0x199   : > { %2673 = shalt.err (!%p2670_p2)
}
 0x19a   : > { %s2674_s26 = scalar_lea.vmem %s3469_s29, 64  ;;  %p2682_p0 = scmp.lt.s32.totalorder %s3469_s29, %s3469_s29 }
 0x19b   : > { %p2675_p10 = scmp.ne.s32.totalorder %s3469_s29, %s2674_s26  ;;  %p2683_p5 = scmp.lt.s32.totalorder %s2674_s26, %s2674_s26 }
 0x19d   : > { %p2677_p11 = pnand %p2675_p10, %p3920_p8  ;;  %p2684_p9 = por %p2683_p5, %p2682_p0 }
 0x19f   : > { %p2678_p3 = pneg %p2677_p11 }
 0x1a1   : > { %p2685_p7 = pnand %p2684_p9, %p2678_p3 }
 0x1a3   : > { %2688 = shalt.err (!%p2685_p7)
}
 0x1a4   : > { %2146 = dma.hbm_to_vmem [thread:$0]  (!%p3921_p6), %s3924_s27, 64, %s3469_s29, [#allocation18], %s2994_s17, %s2994_s17, %s2995_s10  }
 0x1a5   : > { %s2998_s28 = smov [#allocation22]   ;;  %s2999_s18 = smov [#allocation25]  }
 0x1a6   : > { %s617_s1 = sshll.u32 %s2998_s28, 4  ;;  %s639_s23 = sshll.u32 %s2999_s18, 4  ;;  %s618_s1 = int_to_ptr.vmem [resolvable:$true] %s617_s1  ;;  %s3518_s23 = int_to_ptr.vmem [resolvable:$true] %s639_s23 }
 0x1a7   : > { %s3925_s20 = sld [smem:[#allocation61_spill]] }
 0x1ad   : > { %s3926_s26 = smov %s3925_s20  ;;  %s2689_s6 = scalar_lea.hbm %s3925_s20, 16 }
 0x1ae   : > { %p2690_p12 = scmp.ne.s32.totalorder %s3926_s26, %s2689_s6  ;;  %p2696_p1 = scmp.lt.u32.totalorder %s2689_s6, %s3926_s26 }
 0x1b0   : > { %p2692_p13 = pnand %p2690_p12, %p3920_p8 }
 0x1b2   : > { %p2693_p4 = pneg %p2692_p13 }
 0x1b4   : > { %p2698_p2 = pnand %p2696_p1, %p2693_p4 }
 0x1b6   : > { %2701 = shalt.err (!%p2698_p2)
}
 0x1b7   : > { %s2702_s10 = scalar_lea.vmem %s618_s1, 16  ;;  %s2709_s29 = scalar_lea.vmem %s618_s1, 32 }
 0x1b8   : > { %p2703_p10 = scmp.ne.s32.totalorder %s618_s1, %s2702_s10  ;;  %p2710_p0 = scmp.lt.s32.totalorder %s618_s1, %s618_s1 }
 0x1b9   : > { %p2711_p5 = scmp.lt.s32.totalorder %s2709_s29, %s2702_s10 }
 0x1ba   : > { %p2705_p11 = pnand %p2703_p10, %p3920_p8 }
 0x1bb   : > { %p2712_p9 = por %p2711_p5, %p2710_p0 }
 0x1bc   : > { %p2706_p3 = pneg %p2705_p11 }
 0x1be   : > { %p2713_p7 = pnand %p2712_p9, %p2706_p3 }
 0x1c0   : > { %2716 = shalt.err (!%p2713_p7)
}
 0x1c1   : > { %2152 = dma.hbm_to_vmem [thread:$0]  (!%p3921_p6), %s3926_s26, 16, %s618_s1, [#allocation21]  }
 0x1c2   : > { %s3927_s28 = sld [smem:[#allocation63_spill]] }
 0x1c8   : > { %s2717_s18 = scalar_lea.hbm %s3927_s28, 16 }
 0x1c9   : > { %p2718_p12 = scmp.ne.s32.totalorder %s3927_s28, %s2717_s18  ;;  %p2724_p1 = scmp.lt.u32.totalorder %s2717_s18, %s3927_s28 }
 0x1cb   : > { %p2720_p13 = pnand %p2718_p12, %p3920_p8 }
 0x1cd   : > { %p2721_p4 = pneg %p2720_p13 }
 0x1cf   : > { %p2726_p2 = pnand %p2724_p1, %p2721_p4 }
 0x1d1   : > { %2729 = shalt.err (!%p2726_p2)
}
 0x1d2   : > { %s2730_s1 = scalar_lea.vmem %s3518_s23, 16  ;;  %s2737_s17 = scalar_lea.vmem %s3518_s23, 32 }
 0x1d3   : > { %p2731_p10 = scmp.ne.s32.totalorder %s3518_s23, %s2730_s1  ;;  %p2738_p0 = scmp.lt.s32.totalorder %s3518_s23, %s3518_s23 }
 0x1d4   : > { %p2739_p5 = scmp.lt.s32.totalorder %s2737_s17, %s2730_s1 }
 0x1d5   : > { %p2733_p11 = pnand %p2731_p10, %p3920_p8 }
 0x1d6   : > { %p2740_p9 = por %p2739_p5, %p2738_p0 }
 0x1d7   : > { %p2734_p3 = pneg %p2733_p11 }
 0x1d9   : > { %p2741_p7 = pnand %p2740_p9, %p2734_p3 }
 0x1db   : > { %2744 = shalt.err (!%p2741_p7)
}
 0x1dc   : > { %2158 = dma.hbm_to_vmem [thread:$0]  (!%p3921_p6), %s3927_s28, 16, %s3518_s23, [#allocation24]  }
 0x1dd   : > { %s3000_s8 = smov [#allocation28]   ;;  %s3001_s6 = smov [#allocation31]  }
 0x1de   : > { %s663_s16 = sshll.u32 %s3000_s8, 4  ;;  %s687_s5 = sshll.u32 %s3001_s6, 4  ;;  %s664_s16 = int_to_ptr.vmem [resolvable:$true] %s663_s16  ;;  %s3562_s5 = int_to_ptr.vmem [resolvable:$true] %s687_s5 }
 0x1df   : > { %s3928_s9 = sld [smem:[#allocation65_spill]] }
 0x1e5   : > { %s2745_s20 = scalar_lea.hbm %s3928_s9, 16 }
 0x1e6   : > { %p2746_p12 = scmp.ne.s32.totalorder %s3928_s9, %s2745_s20  ;;  %p2752_p1 = scmp.lt.u32.totalorder %s2745_s20, %s3928_s9 }
 0x1e8   : > { %p2748_p13 = pnand %p2746_p12, %p3920_p8 }
 0x1ea   : > { %p2749_p4 = pneg %p2748_p13 }
 0x1ec   : > { %p2754_p2 = pnand %p2752_p1, %p2749_p4 }
 0x1ee   : > { %2757 = shalt.err (!%p2754_p2)
}
 0x1ef   : > { %s2758_s10 = scalar_lea.vmem %s664_s16, 16  ;;  %s2765_s29 = scalar_lea.vmem %s664_s16, 32 }
 0x1f0   : > { %p2759_p10 = scmp.ne.s32.totalorder %s664_s16, %s2758_s10  ;;  %p2766_p0 = scmp.lt.s32.totalorder %s664_s16, %s664_s16 }
 0x1f1   : > { %p2767_p5 = scmp.lt.s32.totalorder %s2765_s29, %s2758_s10 }
 0x1f2   : > { %p2761_p11 = pnand %p2759_p10, %p3920_p8 }
 0x1f3   : > { %p2768_p9 = por %p2767_p5, %p2766_p0 }
 0x1f4   : > { %p2762_p3 = pneg %p2761_p11 }
 0x1f6   : > { %p2769_p7 = pnand %p2768_p9, %p2762_p3 }
 0x1f8   : > { %2772 = shalt.err (!%p2769_p7)
}
 0x1f9   : > { %2164 = dma.hbm_to_vmem [thread:$0]  (!%p3921_p6), %s3928_s9, 16, %s664_s16, [#allocation27]  }
 0x1fa   : > { %s3929_s20 = sld [smem:[#allocation67_spill]] }
 0x200   : > { %s3930_s4 = smov %s3929_s20  ;;  %s2773_s1 = scalar_lea.hbm %s3929_s20, 16 }
 0x201   : > { %p2774_p12 = scmp.ne.s32.totalorder %s3930_s4, %s2773_s1  ;;  %p2780_p1 = scmp.lt.u32.totalorder %s2773_s1, %s3930_s4 }
 0x203   : > { %p2776_p13 = pnand %p2774_p12, %p3920_p8 }
 0x205   : > { %p2777_p4 = pneg %p2776_p13 }
 0x207   : > { %p2782_p2 = pnand %p2780_p1, %p2777_p4 }
 0x209   : > { %2785 = shalt.err (!%p2782_p2)
}
 0x20a   : > { %s2786_s16 = scalar_lea.vmem %s3562_s5, 16  ;;  %s2793_s8 = scalar_lea.vmem %s3562_s5, 32 }
 0x20b   : > { %p2787_p10 = scmp.ne.s32.totalorder %s3562_s5, %s2786_s16  ;;  %p2794_p0 = scmp.lt.s32.totalorder %s3562_s5, %s3562_s5 }
 0x20c   : > { %p2795_p5 = scmp.lt.s32.totalorder %s2793_s8, %s2786_s16 }
 0x20d   : > { %p2789_p11 = pnand %p2787_p10, %p3920_p8 }
 0x20e   : > { %p2796_p9 = por %p2795_p5, %p2794_p0 }
 0x20f   : > { %p2790_p3 = pneg %p2789_p11 }
 0x211   : > { %p2797_p7 = pnand %p2796_p9, %p2790_p3 }
 0x213   : > { %2800 = shalt.err (!%p2797_p7)
}
 0x214   : > { %2170 = dma.hbm_to_vmem [thread:$0]  (!%p3921_p6), %s3930_s4, 16, %s3562_s5, [#allocation30]  }
 0x215   : > { %s1883_s24 = sshll.u32 %s3364_s12, 3  ;;  %s1884_s7 = sshll.u32 %s2971_s21, 7 }
 0x216   : > { %s3931_s17 = sld [smem:[#allocation49_spill]]  ;;  %s702_s3 = scalar_lea.vmem [#allocation2], %s1883_s24 }
 0x217   : > { %s709_s10 = sshll.u32 %s702_s3, 4  ;;  %s699_s29 = scalar_lea.sflag [#allocation3], %s3364_s12  ;;  %s710_s10 = int_to_ptr.vmem [resolvable:$true] %s709_s10 }
 0x218   : > { %p3932_p12 = scmp.ne.s32.totalorder %s3918_s19, 0 }
 0x21c   : > { %s3611_s23 = scalar_lea.hbm %s3931_s17, %s1884_s7  ;;  %s2806_s6 = scalar_lea.hbm %s3931_s17, 256 }
 0x21d   : > { %s2801_s16 = scalar_lea.hbm %s3611_s23, 128  ;;  %p2807_p4 = scmp.lt.u32.totalorder %s3611_s23, %s3931_s17 }
 0x21e   : > { %p2802_p8 = scmp.ne.s32.totalorder %s3611_s23, %s2801_s16  ;;  %p2808_p1 = scmp.lt.u32.totalorder %s2806_s6, %s2801_s16 }
 0x21f   : > { %p2810_p10 = scmp.lt.u32.totalorder %s2801_s16, %s3611_s23 }
 0x220   : > { %p2804_p13 = pnand %p2802_p8, %p3932_p12  ;;  %p2809_p2 = por %p2808_p1, %p2807_p4 }
 0x222   : > { %p2805_p6 = pneg %p2804_p13  ;;  %p2811_p11 = por %p2810_p10, %p2809_p2 }
 0x224   : > { %p2812_p3 = pnand %p2811_p11, %p2805_p6 }
 0x226   : > { %2815 = shalt.err (!%p2812_p3)
}
 0x227   : > { %s2816_s24 = scalar_lea.vmem %s710_s10, 128  ;;  %s3002_s20 = smov [#allocation2]  }
 0x228   : > { %p2817_p0 = scmp.ne.s32.totalorder %s710_s10, %s2816_s24  ;;  %s2821_s1 = sshll.u32 %s3002_s20, 4  ;;  %s2822_s1 = int_to_ptr.vmem [resolvable:$false] %s2821_s1 }
 0x229   : > { %s2823_s3 = scalar_lea.vmem %s2822_s1, 256  ;;  %p2824_p7 = scmp.lt.s32.totalorder %s710_s10, %s2822_s1 }
 0x22a   : > { %p2819_p5 = pnand %p2817_p0, %p3932_p12  ;;  %p2825_p8 = scmp.lt.s32.totalorder %s2823_s3, %s2816_s24 }
 0x22c   : > { %p2820_p9 = pneg %p2819_p5  ;;  %p2826_p13 = por %p2825_p8, %p2824_p7 }
 0x22e   : > { %p2827_p1 = pnand %p2826_p13, %p2820_p9 }
 0x230   : > { %2830 = shalt.err (!%p2827_p1)
}
 0x231   : > { %p3933_p4 = scmp.ne.s32.totalorder %s3915_s25, 0  ;;  %s736_s16 = scalar_lea.vmem [#allocation7], %s3364_s12 }
 0x232   : > { %s743_s5 = sshll.u32 %s736_s16, 4  ;;  %s2831_s8 = scalar_lea.hbm %s3391_s13, 16  ;;  %s744_s5 = int_to_ptr.vmem [resolvable:$true] %s743_s5 }
 0x233   : > { %2174 = dma.hbm_to_vmem [thread:$0]  (!%p3933_p4), %s3611_s23, 128, %s710_s10, %s699_s29  }
 0x234   : > { %p2832_p6 = scmp.ne.s32.totalorder %s3391_s13, %s2831_s8  ;;  %s2836_s7 = scalar_lea.hbm %s3917_s11, 32 }
 0x235   : > { %p2837_p11 = scmp.lt.u32.totalorder %s3391_s13, %s3917_s11  ;;  %p2838_p3 = scmp.lt.u32.totalorder %s2836_s7, %s2831_s8 }
 0x236   : > { %p2834_p2 = pnand %p2832_p6, %p3932_p12  ;;  %p2840_p5 = scmp.lt.u32.totalorder %s2831_s8, %s3391_s13 }
 0x237   : > { %p2839_p0 = por %p2838_p3, %p2837_p11 }
 0x238   : > { %p2835_p10 = pneg %p2834_p2 }
 0x239   : > { %p2841_p9 = por %p2840_p5, %p2839_p0 }
 0x23b   : > { %p2842_p7 = pnand %p2841_p9, %p2835_p10 }
 0x23d   : > { %2845 = shalt.err (!%p2842_p7)
}
 0x23e   : > { %s2846_s12 = scalar_lea.vmem %s744_s5, 16  ;;  %s3003_s23 = smov [#allocation7]  }
 0x23f   : > { %p2847_p8 = scmp.ne.s32.totalorder %s744_s5, %s2846_s12  ;;  %s2851_s10 = sshll.u32 %s3003_s23, 4  ;;  %s2852_s10 = int_to_ptr.vmem [resolvable:$false] %s2851_s10 }
 0x240   : > { %s2853_s29 = scalar_lea.vmem %s2852_s10, 32  ;;  %p2854_p6 = scmp.lt.s32.totalorder %s744_s5, %s2852_s10 }
 0x241   : > { %p2849_p13 = pnand %p2847_p8, %p3932_p12  ;;  %p2855_p2 = scmp.lt.s32.totalorder %s2853_s29, %s2846_s12 }
 0x243   : > { %p2850_p1 = pneg %p2849_p13  ;;  %p2856_p4 = por %p2855_p2, %p2854_p6 }
 0x245   : > { %p2857_p3 = pnand %p2856_p4, %p2850_p1 }
 0x247   : > { %2860 = shalt.err (!%p2857_p3)
}
 0x248   : > { %p3934_p11 = scmp.ne.s32.totalorder %s3915_s25, 0  ;;  %s3935_s1 = sld [smem:[#allocation45_spill]] }
 0x24a   : > { %2180 = dma.hbm_to_vmem [thread:$0]  (!%p3934_p11), %s3391_s13, 16, %s744_s5, %s3393_s15  }
 0x24e   : > { %p3936_p10 = scmp.ne.s32.totalorder %s3935_s1, 0 }
 0x24f   : > { %s3653_s19 = sand.u32 (!%p3936_p10), 1, %s2963_s30   ;;  %p3937_p12 = scmp.ne.s32.totalorder (!%p3936_p10), %s3911_s22, 0 }
 0x250   : > { %752 = sbr.rel (%p3936_p10) target bundleno = 2949 (0xb85), region = 96  ;;  %s1888_s3 = sshll.u32 (!%p3936_p10), %s3653_s19, 3 }
 0x251   : > { %s755_s16 = scalar_lea.sflag (!%p3936_p10), [#allocation3], %s3653_s19  ;;  %s758_s8 = scalar_lea.vmem (!%p3936_p10), [#allocation2], %s1888_s3 }
 0x257   : > { %2914 = dma.done.wait (%p3937_p12), %s755_s16, 128  }
 0x258   : > { %2916 = vsyncadd (%p3937_p12), %s755_s16, 4294967168  ;;  %s763_s13 = sand.u32 1, %s3132_s2   ;;  %s766_s25 = scalar_lea.vmem [#allocation5], %s3653_s19 }
 0x259   : > { %s764_s15 = scalar_lea.sflag [#allocation6], %s763_s13 }
 0x25a   : > { %2918 = dma.done.wait (%p3937_p12), %s764_s15, 32  }
 0x25b   : > { %2920 = vsyncadd (%p3937_p12), %s764_s15, 4294967264  ;;  %s774_s5 = scalar_lea.vmem [#allocation7], %s3653_s19  ;;  %p3938_p4 = scmp.eq.s32.totalorder %s3132_s2, 0 }
 0x25d   : > { %2922 = dma.done.wait (%p3938_p4), [#allocation9], 32   ;;  %p3939_p0 = pmov %p3938_p4 }
 0x25f   : > { %2924 = vsyncadd (%p3939_p0), [#allocation9], 4294967264  ;;  %p3940_p5 = pmov %p3939_p0 }
 0x260   : > { %p3941_p9 = pmov %p3939_p0 }
 0x261   : > { %2926 = dma.done.wait (%p3940_p5), [#allocation12], 1088  }
 0x262   : > { %2928 = vsyncadd (%p3941_p9), [#allocation12], 4294966208  ;;  %p3942_p7 = pmov %p3939_p0 }
 0x263   : > { %p3943_p8 = pmov %p3939_p0 }
 0x264   : > { %2930 = dma.done.wait (%p3942_p7), [#allocation15], 1088  }
 0x265   : > { %2932 = vsyncadd (%p3943_p8), [#allocation15], 4294966208  ;;  %p3944_p13 = pmov %p3939_p0 }
 0x266   : > { %p3945_p1 = pmov %p3939_p0 }
 0x267   : > { %2934 = dma.done.wait (%p3944_p13), [#allocation18], 1088  }
 0x268   : > { %2936 = vsyncadd (%p3945_p1), [#allocation18], 4294966208  ;;  %p3946_p6 = pmov %p3939_p0 }
 0x269   : > { %p3947_p2 = pmov %p3939_p0 }
 0x26a   : > { %2938 = dma.done.wait (%p3946_p6), [#allocation21], 272  }
 0x26b   : > { %2940 = vsyncadd (%p3947_p2), [#allocation21], 4294967024  ;;  %p3948_p3 = pmov %p3939_p0 }
 0x26c   : > { %p3949_p11 = pmov %p3939_p0 }
 0x26d   : > { %2942 = dma.done.wait (%p3948_p3), [#allocation24], 32  }
 0x26e   : > { %2944 = vsyncadd (%p3949_p11), [#allocation24], 4294967264  ;;  %p3950_p10 = pmov %p3939_p0 }
 0x26f   : > { %p3951_p12 = pmov %p3939_p0 }
 0x270   : > { %2946 = dma.done.wait (%p3950_p10), [#allocation27], 272  }
 0x271   : > { %2948 = vsyncadd (%p3951_p12), [#allocation27], 4294967024  ;;  %p3952_p4 = pmov %p3939_p0 }
 0x273   : > { %2950 = dma.done.wait (%p3952_p4), [#allocation30], 1040  }
 0x274   : > { %2952 = vsyncadd (%p3939_p0), [#allocation30], 4294966256  ;;  %vm905_vm0 = vcmask 261120   ;;  %v3702_v0 = vld [vmem:[%s758_s8] sm:$0xff]  ;;  %v1906_v11 = vld [vmem:[#allocation8] ss:$0 sm:$0xff] }
 0x275   : > { %v906_v1 = vsel %vm905_vm0, %v3702_v0, 0.0  ;;  %v1907_v13 = vld [vmem:[#allocation10] ss:$0 sm:$0xff]  ;;  %s3712_s22 = scalar_lea.vmem [#allocation32], %s1888_s3  ;;  %v3714_v17 = vmov 0.0   ;;  %s3716_s6 = smov 0  }
 0x276   : > { %907 = vadd.xlane.f32.xlu0 %v906_v1 }
 0x303   : > { %v908_v2 = vpop.xlane.xlu0 %907 }
 0x304   : > { %v910_v3 = vmul.f32 0.03125, %v908_v2 }
 0x306   : > { %v911_v4 = vsub.f32 %v3702_v0, %v910_v3 }
 0x308   : > { %v912_v5 = vmul.f32 %v911_v4, %v911_v4 }
 0x30a   : > { %v913_v6 = vsel %vm905_vm0, %v912_v5, 0.0 }
 0x30b   : > { %914 = vadd.xlane.f32.xlu0 %v913_v6 }
 0x398   : > { %v915_v7 = vpop.xlane.xlu0 %914 }
 0x399   : > { %v916_v8 = vmul.f32 0.03125, %v915_v7 }
 0x39b   : > { %v917_v9 = vadd.f32 1e-05, %v916_v8 }
 0x39d   : > { %2293 = vrsqrt.f32 %v917_v9 }
 0x3a7   : > { %v2294_v10 = vpop.eup %2293 }
 0x3a8   : > { %v919_v12 = vmul.f32 %v2294_v10, %v911_v4 }
 0x3aa   : > { %v926_v14 = vmul.f32 %v1906_v11, %v919_v12 }
 0x3ac   : > { %v933_v15 = vadd.f32 %v1907_v13, %v926_v14 }
 0x3ae   : > { %v3708_v16 = vpack.c.bf16 %v933_v15, %v933_v15 }
 0x3af LB: >> { %v3004_v18 = vmov 0.0   ;;  %s3725_s18 = sshll.u32 %s2979_s6, 4  ;;  %vm3005_vm1 = vmmov 0   ;;  %s1019_s12 = scalar_lea.vmem [#allocation16], %s2979_s6  ;;  %vm1148_vm2 = vcmask 64512   ;;  %vm1210_vm3 = vcmask 1043456   ;;  %s2979_s6 = sphi %s3716_s6, %s940_s6   ;;  %v2975_v17 = vphi %v3714_v17, %v3953_v17  }
 0x3b0   : >> { %1988 = vmatprep.subr.bf16.mxu1 %v3004_v18  ;;  %1980 = vmatprep.subr.bf16.mxu0 %v3004_v18  ;;  %s1014_s7 = scalar_lea.vmem [#allocation14], %s3725_s18  ;;  %s944_s24 = scalar_lea.vmem [#allocation11], %s3725_s18  ;;  %v1915_v23 = vld [vmem:[%s1019_s12] ss:$0 sm:$0xff] }
 0x3b1   : >> { %1992 = vmatprep.mubr.msk.bf16.mxu1 %vm3005_vm1, %v3004_v18  ;;  %1984 = vmatprep.mubr.msk.bf16.mxu0 %vm3005_vm1, %v3004_v18  ;;  %v2295_v19 = vld [vmem:[%s1014_s7] sm:$0xff]   ;;  %v2297_v21 = vld [vmem:[%s1014_s7 + $0x8] sm:$0xff]   ;;  %s1080_s20 = scalar_lea.vmem [#allocation17], %s3725_s18  ;;  %s949_s23 = scalar_lea.vmem [#allocation13], %s2979_s6 }
 0x3b2   : >> { %v2296_v20 = vld [vmem:[%s944_s24] sm:$0xff]   ;;  %1989 = vmatpush3.bf16.msra.mxu1 %v2295_v19  ;;  %v2298_v22 = vld [vmem:[%s944_s24 + $0x8] sm:$0xff]   ;;  %s1085_s10 = scalar_lea.vmem [#allocation19], %s2979_s6  ;;  %s1926_s29 = sshll.u32 %s2979_s6, 2 }
 0x3b3   : >> { %1990 = vmatprep.subr.bf16.mxu1 %v3004_v18  ;;  %1981 = vmatpush3.bf16.msra.mxu0 %v2296_v20  ;;  %v1910_v24 = vld [vmem:[%s949_s23] ss:$0 sm:$0xff]  ;;  %v2300_v40 = vld [vmem:[%s1080_s20 + $0x8] sm:$0xff]   ;;  %s1256_s1 = scalar_lea.vmem [#allocation20], %s1926_s29  ;;  %s940_s6 = sadd.s32 1, %s2979_s6  }
 0x3b4   : >> { %1982 = vmatprep.subr.bf16.mxu0 %v3004_v18  ;;  %v2299_v39 = vld [vmem:[%s1080_s20] sm:$0xff]   ;;  %p937_p5 = scmp.ge.s32.totalorder %s940_s6, 4  }
 0x3b5   : >> { %v1920_v54 = vld [vmem:[%s1085_s10] ss:$0 sm:$0xff]  ;;  %v3006_v13 = vmov (%p937_p5), 0   ;;  %v1928_v14 = vld [vmem:[#allocation22] ss:$0 sm:$0xff] (%p937_p5)  ;;  %vm3008_vm4 = vmmov (%p937_p5), 0  }
 0x3b6   : >> { %1991 = vmatpush3.bf16.msra.mxu1 %v2297_v21  ;;  %v1257_v59 = vld [vmem:[%s1256_s1] sm:$0xf]  ;;  %2305 = vset.pattern.permute.xlu0 (%p937_p5), %v3006_v13  ;;  %s1947_s3 = sshll.u32 (%p937_p5), %s3132_s2, 7  ;;  %s1586_s16 = sshll.u32 (%p937_p5), %s3712_s22, 4  ;;  %s3782_s16 = int_to_ptr.vmem [resolvable:$true] %s1586_s16 }
 0x3b7   : >> { %1983 = vmatpush3.bf16.msra.mxu0 %v2298_v22  ;;  %2004 = vmatprep.subr.bf16.mxu1 %v3004_v18  ;;  %v1262_v60 = vsel %vm1210_vm3, %v1257_v59, 0  ;;  %v1929_v12 = vld [vmem:[%s766_s25] ss:$0 sm:$0xff] (%p937_p5)  ;;  %s3954_s15 = sld [smem:[#allocation68_spill]] (%p937_p5)  ;;  %s2861_s6 = scalar_lea.vmem (%p937_p5), %s3782_s16, 128 }
 0x3b8   : >> { %1996 = vmatprep.subr.bf16.mxu0 %v3004_v18  ;;  %2306 = vset.pattern.permute.xlu1 (%p937_p5), %v3006_v13  ;;  %p2862_p9 = scmp.ne.s32.totalorder (%p937_p5), %s3782_s16, %s2861_s6  ;;  %p3955_p7 = scmp.ne.s32.totalorder (%p937_p5), %s3912_s14, 0 }
 0x3b9   : >> { %1993 = vmatmul.mubr.msk.bf16.vlgmr.msra.gmra.mrb[0].mxu1 %vm905_vm0, %v3708_v16  ;;  %s3010_s2 = smov (%p937_p5), [#allocation32]  }
 0x3ba   : >> { %1985 = vmatmul.mubr.msk.bf16.vlgmr.msra.gmra.mrb[0].mxu0 %vm905_vm0, %v3708_v16  ;;  %2006 = vmatprep.mubr.msk.bf16.mxu1 %vm3005_vm1, %v3004_v18  ;;  %p2863_p8 = pnand (%p937_p5), %p2862_p9, %p3955_p7  ;;  %s2865_s18 = sshll.u32 (%p937_p5), %s3010_s2, 4  ;;  %s2866_s18 = int_to_ptr.vmem [resolvable:$false] %s2865_s18 }
 0x3bb   : >> { %2000 = vmatprep.mubr.msk.bf16.mxu0 %vm3005_vm1, %v3004_v18  ;;  %1997 = vmatpush3.bf16.msra.mxu0 %v2299_v39  ;;  %v2311_v39 = vld [vmem:[#allocation29 + $0x10] sm:$0xff] (%p937_p5)   ;;  %s2867_s7 = scalar_lea.vmem (%p937_p5), %s2866_s18, 256  ;;  %p2868_p1 = scmp.lt.s32.totalorder (%p937_p5), %s3782_s16, %s2866_s18 }
 0x3bc   : >> { %1998 = vmatprep.subr.bf16.mxu0 %v3004_v18  ;;  %p2864_p13 = pneg (%p937_p5), %p2863_p8  ;;  %p2869_p6 = scmp.lt.s32.totalorder (%p937_p5), %s2867_s7, %s2861_s6 }
 0x3bd   : > { %s3780_s25 = scalar_lea.hbm (%p937_p5), %s3954_s15, %s1947_s3 }
 0x3be   : > { %p2870_p2 = por (%p937_p5), %p2869_p6, %p2868_p1 }
 0x3bf   : >> { %1999 = vmatpush3.bf16.msra.mxu0 %v2300_v40  ;;  %v2312_v40 = vld [vmem:[#allocation29 + $0x18] sm:$0xff] (%p937_p5)  }
 0x3c0   : >> { %2010 = vmatprep.subr.bf16.mxu0 %v3004_v18  ;;  %p2871_p3 = pnand (%p937_p5), %p2870_p2, %p2864_p13 }
 0x3c2   : >> { %2001 = vmatmul.mubr.msk.bf16.vlgmr.msra.gmra.mrb[4].mxu0 %vm905_vm0, %v3708_v16 }
 0x3c3   : >> { %2012 = vmatprep.mubr.msk.bf16.mxu0 %vm3005_vm1, %v3004_v18 }
 0x48c   : >> { %v1073_v25 = vpop.f32.mrb[0].mxu1 }
 0x48d   : >> { %v1074_v26 = vadd.f32 %v1915_v23, %v1073_v25  ;;  %v1994_v27 = vpop.f32.mrb[1].mxu1  ;;  %v1006_v28 = vpop.f32.mrb[0].mxu0  ;;  %v2307_v25 = vld [vmem:[#allocation26] sm:$0xff] (%p937_p5)  }
 0x48e   : >> { %v1076_v29 = vpop.f32.mrb[2].mxu1  ;;  %v1007_v30 = vadd.f32 %v1910_v24, %v1006_v28  ;;  %v1986_v31 = vpop.f32.mrb[1].mxu0 }
 0x48f   : >> { %v1146_v32 = vpack.c.bf16 %v1074_v26, %v1074_v26  ;;  %v1995_v33 = vpop.f32.mrb[3].mxu1  ;;  %v1009_v34 = vpop.f32.mrb[2].mxu0  ;;  %v3007_v26 = vmov (%p937_p5), 0.0   ;;  %v1930_v31 = vld [vmem:[#allocation23] ss:$0 sm:$0xff] (%p937_p5) }
 0x490   : >> { %v1987_v35 = vpop.f32.mrb[3].mxu0  ;;  %v1012_v37 = vmul.f32 0.35355338, %v1007_v30  ;;  %v1931_v33 = vld [vmem:[#allocation25] ss:$0 sm:$0xff] (%p937_p5) }
 0x491   : >> { %v1153_v36 = vsel %vm1148_vm2, %v1146_v32, 0 }
 0x492   : >> { %2005 = vmatpush3.bf16.xpose.msra.mxu1 %v1153_v36  ;;  %v1145_v38 = vpack.c.bf16 %v1012_v37, %v1012_v37  ;;  %v2309_v37 = vld [vmem:[#allocation29] sm:$0xff] (%p937_p5)  }
 0x493   : >> { %2016 = vmatprep.subr.bf16.mxu1 %v3004_v18 }
 0x495   : >> { %v1139_v51 = vpop.f32.mrb[4].mxu0 }
 0x496   : >> { %v2002_v52 = vpop.f32.mrb[5].mxu0  ;;  %v1140_v56 = vadd.f32 %v1920_v54, %v1139_v51 }
 0x497   : >> { %v1142_v53 = vpop.f32.mrb[6].mxu0 }
 0x498   : >> { %v2003_v55 = vpop.f32.mrb[7].mxu0  ;;  %v1147_v57 = vpack.c.bf16 %v1140_v56, %v1140_v56 }
 0x499   : >> { %2007 = vmatmul.mubr.msk.bf16.vlgmr.msra.gmra.mrb[4].mxu1 %vm1148_vm2, %v1145_v38  ;;  %v2310_v38 = vld [vmem:[#allocation29 + $0x8] sm:$0xff] (%p937_p5)  }
 0x49a   : >> { %2018 = vmatprep.mubr.msk.bf16.mxu1 %vm3005_vm1, %v3004_v18  ;;  %v1212_v58 = vsel %vm1210_vm3, %v1147_v57, 0  ;;  %2017 = vmatpush3.bf16.msra.mxu1 %v1262_v60 }
 0x49b   : >> { %2011 = vmatpush3.bf16.msra.mxu0 %v1212_v58  ;;  %2030 = vmatprep.subr.bf16.mxu1 (%p937_p5), %v3007_v26 }
 0x49c   : > { %2022 = vmatprep.subr.bf16.mxu0 (%p937_p5), %v3007_v26 }
 0x56c   : >> { %v1189_v41 = vpop.f32.mrb[4].mxu1 }
 0x56d   : >> { %v2008_v42 = vpop.f32.mrb[5].mxu1  ;;  %v1195_v43 = vsel %vm1148_vm2, %v1189_v41, -inf }
 0x56e   : >> { %1196 = vmax.xlane.f32.xlu0 %v1195_v43  ;;  %v1192_v44 = vpop.f32.mrb[6].mxu1  ;;  %v2314_v42 = vld [vmem:[#allocation29 + $0x28] sm:$0xff] (%p937_p5)   ;;  %v2315_v43 = vld [vmem:[#allocation29 + $0x30] sm:$0xff] (%p937_p5)  }
 0x56f   : >> { %v2009_v45 = vpop.f32.mrb[7].mxu1  ;;  %v2316_v44 = vld [vmem:[#allocation29 + $0x38] sm:$0xff] (%p937_p5)  }
 0x570   : > { %v1945_v45 = vld [vmem:[%s774_s5] ss:$0 sm:$0xff] (%p937_p5)  ;;  %s1573_s5 = scalar_lea.sflag (%p937_p5), [#allocation4], %s3653_s19 }
 0x5fb   : >> { %v1197_v46 = vpop.xlane.xlu0 %1196 }
 0x5fc   : >> { %v1198_v47 = vsub.f32 %v1189_v41, %v1197_v46  ;;  %v2313_v41 = vld [vmem:[#allocation29 + $0x20] sm:$0xff] (%p937_p5)   ;;  %v1932_v46 = vld [vmem:[#allocation28] ss:$0 sm:$0xff] (%p937_p5) }
 0x5fe   : >> { %v1199_v48 = vmul.f32 1.442695, %v1198_v47 }
 0x600   : >> { %2301 = vpow2.f32 %v1199_v48 }
 0x60a   : >> { %v2302_v49 = vpop.eup %2301 }
 0x60b   : >> { %v1201_v50 = vsel %vm1148_vm2, %v2302_v49, 0.0 }
 0x60c   : >> { %1202 = vadd.xlane.f32.xlu0 %v1201_v50 }
 0x622   : > { %1320 = vperm.xlu0 (%p937_p5), %2305, %v1929_v12  }
 0x699   : >> { %v1203_v61 = vpop.xlane.xlu0 %1202 }
 0x69a   : >> { %2303 = vrcp.f32 %v1203_v61 }
 0x6a4   : >> { %v2304_v62 = vpop.eup %2303 }
 0x6a5   : >> { %v1205_v63 = vmul.f32 %v2304_v62, %v2302_v49 }
 0x6a7   : >> { %v1206_v1 = vpack.c.bf16 %v1205_v63, %v1205_v63 }
 0x6a9   : >> { %2013 = vmatmul.mubr.msk.bf16.vlgmr.msra.gmra.mrb[8].mxu0 %vm1148_vm2, %v1206_v1 }
 0x6aa   : > { %2026 = vmatprep.mubr.msk.bf16.mxu0 (%p937_p5), %vm3008_vm4, %v3007_v26  ;;  %2023 = vmatpush3.bf16.msra.mxu0 (%p937_p5), %v2307_v25 }
 0x6ab   : > { %2024 = vmatprep.subr.bf16.mxu0 (%p937_p5), %v3007_v26 }
 0x77c   : >> { %v1248_v2 = vpop.f32.mrb[8].mxu0 }
 0x77d   : >> { %v1254_v3 = vpack.c.bf16 %v1248_v2, %v1248_v2  ;;  %v2014_v4 = vpop.f32.mrb[9].mxu0 }
 0x77e   : >> { %v1251_v5 = vpop.f32.mrb[10].mxu0 }
 0x77f   : >> { %v2015_v6 = vpop.f32.mrb[11].mxu0  ;;  %2019 = vmatmul.mubr.msk.bf16.vlgmr.msra.gmra.mrb[8].mxu1 %vm1148_vm2, %v1254_v3 }
 0x780   : > { %2046 = vmatprep.mubr.msk.bf16.mxu1 (%p937_p5), %vm3008_vm4, %v3007_v26  ;;  %2031 = vmatpush3.bf16.msra.mxu1 (%p937_p5), %v2309_v37 }
 0x781   : > { %2032 = vmatprep.subr.bf16.mxu1 (%p937_p5), %v3007_v26 }
 0x784   : > { %2033 = vmatpush3.bf16.msra.mxu1 (%p937_p5), %v2310_v38 }
 0x785   : > { %2034 = vmatprep.subr.bf16.mxu1 (%p937_p5), %v3007_v26 }
 0x788   : > { %2035 = vmatpush3.bf16.msra.mxu1 (%p937_p5), %v2311_v39 }
 0x789   : > { %2036 = vmatprep.subr.bf16.mxu1 (%p937_p5), %v3007_v26 }
 0x78c   : > { %2037 = vmatpush3.bf16.msra.mxu1 (%p937_p5), %v2312_v40 }
 0x78d   : > { %2038 = vmatprep.subr.bf16.mxu1 (%p937_p5), %v3007_v26 }
 0x790   : > { %2039 = vmatpush3.bf16.msra.mxu1 (%p937_p5), %v2313_v41 }
 0x791   : > { %2040 = vmatprep.subr.bf16.mxu1 (%p937_p5), %v3007_v26 }
 0x794   : > { %2041 = vmatpush3.bf16.msra.mxu1 (%p937_p5), %v2314_v42 }
 0x795   : > { %2042 = vmatprep.subr.bf16.mxu1 (%p937_p5), %v3007_v26 }
 0x798   : > { %2043 = vmatpush3.bf16.msra.mxu1 (%p937_p5), %v2315_v43 }
 0x799   : > { %2044 = vmatprep.subr.bf16.mxu1 (%p937_p5), %v3007_v26 }
 0x79c   : > { %2045 = vmatpush3.bf16.msra.mxu1 (%p937_p5), %v2316_v44 }
 0x84f   : > { %939 = sbr.rel (!%p937_p5) target bundleno = 943 (0x3af), region = 243 }
 0x852   : >> { %v1298_v7 = vpop.f32.mrb[8].mxu1 }
 0x853   : >> { %v1304_v8 = vadd.f32 %v2975_v17, %v1298_v7   ;;  %v2020_v9 = vpop.f32.mrb[9].mxu1 }
 0x854   : >> { %v1301_v10 = vpop.f32.mrb[10].mxu1  ;;  %v3009_v9 = vmov (%p937_p5), -1.0  }
 0x855   : >> { %v2021_v11 = vpop.f32.mrb[11].mxu1  ;;  %v3953_v17 = vmov %v1304_v8  ;;  %v1312_v15 = vadd.f32 (%p937_p5), %v1928_v14, %v1304_v8 }
 0x856   : > { %v1321_v17 = vpop.permute.xlu0 %1320 }
 0x857   : > { %v1323_v18 = vmul.f32 %v1321_v17, %v1312_v15  ;;  %v1936_v17 = vld [vmem:[#allocation31] ss:$0 sm:$0xff] }
 0x859   : > { %v3765_v19 = vadd.f32 %v1323_v18, %v3702_v0  ;;  %v2308_v0 = vld [vmem:[#allocation26 + $0x8] sm:$0xff]  }
 0x85a   : > { %2025 = vmatpush3.bf16.msra.mxu0 %v2308_v0 }
 0x85b   : > { %v1327_v20 = vsel %vm905_vm0, %v3765_v19, 0.0 }
 0x85c   : > { %1328 = vadd.xlane.f32.xlu0 %v1327_v20 }
 0x8e9   : > { %v1329_v21 = vpop.xlane.xlu0 %1328 }
 0x8ea   : > { %v1330_v22 = vmul.f32 0.03125, %v1329_v21 }
 0x8ec   : > { %v1331_v16 = vsub.f32 %v3765_v19, %v1330_v22 }
 0x8ee   : > { %v1332_v23 = vmul.f32 %v1331_v16, %v1331_v16 }
 0x8f0   : > { %v1333_v24 = vsel %vm905_vm0, %v1332_v23, 0.0 }
 0x8f1   : > { %1334 = vadd.xlane.f32.xlu1 %v1333_v24 }
 0x902   : > { %1566 = vperm.xlu1 %2306, %v1945_v45  }
 0x97e   : > { %v1335_v27 = vpop.xlane.xlu1 %1334 }
 0x97f   : > { %v1336_v28 = vmul.f32 0.03125, %v1335_v27 }
 0x981   : > { %v1337_v29 = vadd.f32 1e-05, %v1336_v28 }
 0x982   : > { %v1567_v20 = vpop.permute.xlu1 %1566 }
 0x983   : > { %2317 = vrsqrt.f32 %v1337_v29 }
 0x98d   : > { %v2318_v30 = vpop.eup %2317 }
 0x98e   : > { %v1339_v32 = vmul.f32 %v2318_v30, %v1331_v16 }
 0x990   : > { %v1346_v34 = vmul.f32 %v1930_v31, %v1339_v32 }
 0x992   : > { %v1353_v35 = vadd.f32 %v1931_v33, %v1346_v34 }
 0x994   : > { %v1354_v36 = vpack.c.bf16 %v1353_v35, %v1353_v35 }
 0x996   : > { %2027 = vmatmul.mubr.msk.bf16.vlgmr.msra.gmra.mrb[0].mxu0 %vm905_vm0, %v1354_v36 }
 0xa69   : > { %v1415_v47 = vpop.f32.mrb[0].mxu0 }
 0xa6a   : > { %v1416_v48 = vadd.f32 %v1932_v46, %v1415_v47  ;;  %v2028_v49 = vpop.f32.mrb[1].mxu0 }
 0xa6b   : > { %v1418_v50 = vpop.f32.mrb[2].mxu0 }
 0xa6c   : > { %v1422_v51 = vmul.f32 0.70710677, %v1416_v48  ;;  %v2029_v52 = vpop.f32.mrb[3].mxu0  ;;  %v1421_v12 = vmul.f32 0.5, %v1416_v48 }
 0xa6e   : > { %v1425_v53 = vand.u32 2147483647, %v1422_v51  ;;  %vm1423_vm5 = vcmp.ge.f32.partialorder %v1422_v51, 0.0 }
 0xa6f   : > { %v1424_v10 = vsel %vm1423_vm5, 1.0, %v3009_v9 }
 0xa70   : > { %v1426_v54 = vmul.f32 0.3275911, %v1425_v53  ;;  %v1438_v56 = vsub.f32 0.0, %v1425_v53 }
 0xa72   : > { %v1427_v55 = vadd.f32 1.0, %v1426_v54  ;;  %v1439_v58 = vmul.f32 %v1438_v56, %v1425_v53 }
 0xa74   : > { %2319 = vrcp.f32 %v1427_v55  ;;  %v1440_v61 = vmul.f32 1.442695, %v1439_v58 }
 0xa76   : > { %2321 = vpow2.f32 %v1440_v61 }
 0xa7e   : > { %v2320_v57 = vpop.eup %2319 }
 0xa7f   : > { %v1429_v59 = vmul.f32 1.0614054, %v2320_v57 }
 0xa80   : > { %v2322_v6 = vpop.eup %2321 }
 0xa81   : > { %v1430_v60 = vadd.f32 -1.4531521, %v1429_v59 }
 0xa83   : > { %v1431_v62 = vmul.f32 %v2320_v57, %v1430_v60 }
 0xa85   : > { %v1432_v63 = vadd.f32 1.4214138, %v1431_v62 }
 0xa87   : > { %v1433_v1 = vmul.f32 %v2320_v57, %v1432_v63 }
 0xa89   : > { %v1434_v2 = vadd.f32 -0.28449672, %v1433_v1 }
 0xa8b   : > { %v1435_v3 = vmul.f32 %v2320_v57, %v1434_v2 }
 0xa8d   : > { %v1436_v4 = vadd.f32 0.2548296, %v1435_v3 }
 0xa8f   : > { %v1437_v5 = vmul.f32 %v2320_v57, %v1436_v4 }
 0xa91   : > { %v1442_v7 = vmul.f32 %v2322_v6, %v1437_v5 }
 0xa93   : > { %v1443_v8 = vsub.f32 1.0, %v1442_v7 }
 0xa95   : > { %v1444_v11 = vmul.f32 %v1443_v8, %v1424_v10 }
 0xa97   : > { %v1445_v13 = vadd.f32 1.0, %v1444_v11 }
 0xa99   : > { %v1446_v14 = vmul.f32 %v1445_v13, %v1421_v12 }
 0xa9b   : > { %v1447_v15 = vpack.c.bf16 %v1446_v14, %v1446_v14 }
 0xa9d   : > { %2047 = vmatmul.mubr.bf16.vlgmr.msra.gmra.mrb[0].mxu1 %v1447_v15 }
 0xb70   : > { %v1553_v18 = vpop.f32.mrb[0].mxu1 }
 0xb71   : > { %v1554_v21 = vadd.f32 %v1936_v17, %v1553_v18  ;;  %v2048_v22 = vpop.f32.mrb[1].mxu1 }
 0xb72   : > { %v1556_v16 = vpop.f32.mrb[2].mxu1 }
 0xb73   : > { %v1569_v23 = vmul.f32 %v1567_v20, %v1554_v21  ;;  %v2049_v24 = vpop.f32.mrb[3].mxu1 }
 0xb75   : > { %v1570_v25 = vadd.f32 %v1569_v23, %v3765_v19 }
 0xb77   : > { %1571 = vst.msk [vmem:[%s3712_s22] sm:$0xff] %vm905_vm0, %v1570_v25 }
 0xb78   : > { %2874 = shalt.err (!%p2871_p3)
}
 0xb79   : > { %s2875_s19 = scalar_lea.hbm %s3780_s25, 128  ;;  %s2879_s20 = scalar_lea.hbm %s3954_s15, 256 }
 0xb7a   : > { %p2876_p11 = scmp.ne.s32.totalorder %s3780_s25, %s2875_s19  ;;  %p2880_p4 = scmp.lt.u32.totalorder %s3780_s25, %s3954_s15 }
 0xb7b   : > { %p2881_p0 = scmp.lt.u32.totalorder %s2879_s20, %s2875_s19  ;;  %p2883_p9 = scmp.lt.u32.totalorder %s2875_s19, %s3780_s25 }
 0xb7c   : > { %p2877_p10 = pnand %p2876_p11, %p3955_p7 }
 0xb7d   : > { %p2882_p5 = por %p2881_p0, %p2880_p4 }
 0xb7e   : > { %p2878_p12 = pneg %p2877_p10 }
 0xb7f   : > { %p2884_p8 = por %p2883_p9, %p2882_p5 }
 0xb81   : > { %p2885_p13 = pnand %p2884_p8, %p2878_p12 }
 0xb83   : > { %2888 = shalt.err (!%p2885_p13)
}
 0xb84   : > { %2120 = dma.vmem_to_hbm [thread:$0]  (%p3955_p7), %s3782_s16, 128, %s3780_s25, %s1573_s5  }
 0xb85 PF: > { %s3956_s10 = sld [smem:[#allocation48_spill]]  ;;  %s1598_s29 = sand.u32 1, %s2959_s0  }
 0xb86   : > { %p3958_p6 = scmp.ge.s32.totalorder %s2971_s21, 2  ;;  %s1599_s1 = scalar_lea.sflag [#allocation4], %s1598_s29 }
 0xb8b   : > { %p3957_p1 = scmp.ne.s32.totalorder %s3956_s10, 0 }
 0xb8d   : > { %p2182_p2 = pnand %p3958_p6, %p3957_p1 }
 0xb8f   : > { %2954 = dma.done.wait (!%p2182_p2), %s1599_s1, 128  }
 0xb90   : > { %2956 = vsyncadd (!%p2182_p2), %s1599_s1, 4294967168  ;;  %s3959_s21 = sld [smem:[#allocation46_spill]]  ;;  %s3960_s3 = sld [smem:[#allocation44_spill]] }
 0xb91   : > { %s3961_s20 = sld [smem:[#allocation47_spill]]  ;;  %s3962_s0 = smov %s2963_s30 }
 0xb96   : > { %p43_p3 = scmp.ge.s32.totalorder %s3959_s21, 4   ;;  %s3963_s30 = smov %s3960_s3 }
 0xb98   :  { %45 = sbr.rel (!%p43_p3) target bundleno = 36 (0x24), region = 254 }
 0xb9f   :  { %1604 = vsyncpa [#allocation3], 1 }
 0xba0   :  { %1606 = vsyncpa [#allocation3 + $0x1], 1 }
 0xba1   :  { %1607 = vsyncpa [#allocation6], 1 }
 0xba2   :  { %1609 = vsyncpa [#allocation6 + $0x1], 1 }
 0xba3   :  { %1610 = vsyncpa [#allocation9], 1 }
 0xba4   :  { %1611 = vsyncpa [#allocation12], 1 }
 0xba5   :  { %1612 = vsyncpa [#allocation15], 1 }
 0xba6   :  { %1613 = vsyncpa [#allocation18], 1 }
 0xba7   :  { %1614 = vsyncpa [#allocation21], 1 }
 0xba8   :  { %1615 = vsyncpa [#allocation24], 1 }
 0xba9   :  { %1616 = vsyncpa [#allocation27], 1 }
 0xbaa   :  { %1617 = vsyncpa [#allocation30], 1 }
 0xbab   :  { %1618 = vsyncpa [#allocation4], 1 }
 0xbac   :  { %1620 = vsyncpa [#allocation4 + $0x1], 1 }

</bundles_post_ra>
